<compile_context>
chip_gen: v7x
topology: tpu7x:2x2x1
jax: 0.10.0
libtpu: 0.0.40
codegen_flags: <defaults>
</compile_context>

<pallas_src>
import functools

import jax
import jax.numpy as jnp
from jax.experimental import pallas as pl
from jax.experimental.pallas import tpu as pltpu


def _round_up(x, m):
    return ((x + m - 1) // m) * m


# --------------------------------------------------------------------------
# Pallas kernel: 3x3 conv (stride 1, pad 1), optional ReLU.
# One grid step = (batch n, cout tile co, row tile r).
# --------------------------------------------------------------------------
def _conv3x3_kernel(x_ref, w_ref, b_ref, o_ref, *, block_rows, W, apply_relu):
    # x_ref : (1, H_t+2, W+2, cin_p)  bf16  zero-padded image (resident per n)
    # w_ref : (9, cin_p, tco)         bf16  tap-major weight tile
    # b_ref : (1, tco)                f32   bias tile
    # o_ref : (1, block_rows, W, tco)       output row/cout tile
    r = pl.program_id(2)
    row0 = pl.multiple_of(r * block_rows, block_rows)
    cin_p = x_ref.shape[3]
    tco = o_ref.shape[3]

    acc = jnp.zeros((block_rows * W, tco), jnp.float32)
    for ky in range(3):
        # Hoisted ky window: (block_rows, W+2, cin_p); C on lanes, W on sublanes.
        rows = x_ref[0, pl.ds(row0 + ky, block_rows), :, :]
        for kx in range(3):
            # kx shift = sublane slice; (rows, W) -> M is a leading-axis merge
            # (no lane->sublane retile), feeding the MXU directly.
            patch = rows[:, kx:kx + W, :].reshape(block_rows * W, cin_p)
            acc += jnp.dot(patch, w_ref[ky * 3 + kx],
                           preferred_element_type=jnp.float32)

    acc += b_ref[...]
    if apply_relu:
        acc = jnp.maximum(acc, 0.0)
    o_ref[0] = acc.reshape(block_rows, W, tco).astype(o_ref.dtype)


def conv3x3_pallas(xp, w9, b2, *, H_t, W, cin_p, cout_p, block_rows, cout_tile,
                   apply_relu, out_dtype=jnp.bfloat16):
    """3x3 conv, stride 1, padding 1, on a pre-padded NHWC(bf16) input.

    xp : (N, H_t+2, W+2, cin_p) bf16, zero spatial border / ragged filler
    w9 : (9, cin_p, cout_p) bf16     b2 : (1, cout_p) f32
    out: (N, H_t, W, cout_p) out_dtype
    """
    N = xp.shape[0]
    assert xp.shape == (N, H_t + 2, W + 2, cin_p), xp.shape
    assert H_t % block_rows == 0 and cout_p % cout_tile == 0
    n_rt = H_t // block_rows
    n_co = cout_p // cout_tile

    kernel = functools.partial(_conv3x3_kernel, block_rows=block_rows, W=W,
                               apply_relu=apply_relu)

    out_itemsize = jnp.dtype(out_dtype).itemsize
    in_blk = (H_t + 2) * (W + 2) * cin_p * 2
    w_blk = 9 * cin_p * cout_tile * 2
    b_blk = cout_tile * 4
    o_blk = block_rows * W * cout_tile * out_itemsize
    acc_b = block_rows * W * cout_tile * 4
    vmem_est = 2 * (in_blk + w_blk + b_blk + o_blk) + acc_b
    try:
        vmem_cap = pltpu.get_tpu_info().vmem_capacity_bytes
    except Exception:
        vmem_cap = 64 * 2 ** 20
    vmem_limit = int(min(max(2 * vmem_est, 32 * 2 ** 20),
                         max(int(0.9 * vmem_cap), vmem_est + (2 << 20))))

    cost = pl.CostEstimate(
        flops=2 * 9 * N * H_t * W * cin_p * cout_p,
        transcendentals=0,
        bytes_accessed=(N * (H_t + 2) * (W + 2) * cin_p * 2
                        + 9 * cin_p * cout_p * 2 + cout_p * 4
                        + N * H_t * W * cout_p * out_itemsize))

    return pl.pallas_call(
        kernel,
        out_shape=jax.ShapeDtypeStruct((N, H_t, W, cout_p), out_dtype),
        grid_spec=pltpu.PrefetchScalarGridSpec(
            num_scalar_prefetch=0,
            grid=(N, n_co, n_rt),
            in_specs=[
                # full padded image, index constant over (co, r) -> resident per n
                pl.BlockSpec((1, H_t + 2, W + 2, cin_p),
                             lambda n, co, r: (n, 0, 0, 0)),
                # weight / bias tile for this cout tile
                pl.BlockSpec((9, cin_p, cout_tile), lambda n, co, r: (0, 0, co)),
                pl.BlockSpec((1, cout_tile), lambda n, co, r: (0, co)),
            ],
            out_specs=pl.BlockSpec((1, block_rows, W, cout_tile),
                                   lambda n, co, r: (n, r, 0, co)),
        ),
        compiler_params=pltpu.CompilerParams(
            dimension_semantics=("parallel", "parallel", "parallel"),
            vmem_limit_bytes=vmem_limit),
        cost_estimate=cost,
    )(xp, w9, b2)


# --------------------------------------------------------------------------
# DoReFa weight quantization (glue, parameter transform)
# --------------------------------------------------------------------------
def dorefa_quantize_weight(w, nbits=8):
    t = jnp.tanh(w)
    denom = 2.0 * jnp.maximum(jnp.max(jnp.abs(t)), 1e-8)
    t = t / denom + 0.5                                  # map into [0, 1]
    n = float(2 ** nbits - 1)
    q = jnp.round(t * n) / n                             # k-bit uniform quant
    return 2.0 * q - 1.0                                 # back to [-1, 1]


# --------------------------------------------------------------------------
# Parameter construction
# --------------------------------------------------------------------------
def make_params(key, fpn_channels, classify_channels, num_anchors, num_classes):
    """Returns (kernel_params, ref_params).

    kernel_params[i] = (w9 bf16 (9,cin_p,cout_p), b2 f32 (1,cout_p), cin_p, cout_p)
    ref_params[i]    = (w_hwio f32 (3,3,ci,co),  b f32 (co,))
    """
    layer_dims = []
    cin = fpn_channels
    for _ in range(4):
        layer_dims.append((cin, classify_channels))
        cin = classify_channels
    layer_dims.append((cin, num_anchors * num_classes))

    kernel_params, ref_params = [], []
    for (ci, co) in layer_dims:
        key, kw, kb = jax.random.split(key, 3)
        fan_in = ci * 9
        w = jax.random.normal(kw, (3, 3, ci, co), jnp.float32) / jnp.sqrt(fan_in)
        b = 0.01 * jax.random.normal(kb, (co,), jnp.float32)
        wq = dorefa_quantize_weight(w)
        ref_params.append((wq, b))

        ci_p, co_p = _round_up(ci, 128), _round_up(co, 128)
        w_pad = jnp.zeros((3, 3, ci_p, co_p), jnp.float32)
        w_pad = w_pad.at[:, :, :ci, :co].set(wq)
        w9 = w_pad.reshape(9, ci_p, co_p).astype(jnp.bfloat16)
        b_pad = jnp.zeros((1, co_p), jnp.float32).at[0, :co].set(b)
        kernel_params.append((w9, b_pad, ci_p, co_p))
    return kernel_params, ref_params


# --------------------------------------------------------------------------
# Full forward (matches ClassificationHead.forward semantics)
# --------------------------------------------------------------------------
def classification_head_forward(x_nchw, kernel_params, num_anchors, num_classes,
                                block_rows=8):
    N, C, H, W = x_nchw.shape
    # Bound the matmul M dim (block_rows*W) to ~128..256 -> accumulator in vregs.
    br = max(1, min(block_rows, max(1, 256 // W)))
    H_t = br * ((H + br - 1) // br)                 # pad H to block_rows multiple

    x = jnp.transpose(x_nchw, (0, 2, 3, 1)).astype(jnp.bfloat16)   # NCHW -> NHWC
    n_layers = len(kernel_params)
    for i, (w9, b2, ci_p, co_p) in enumerate(kernel_params):
        last = i == n_layers - 1
        ci = x.shape[-1]
        cout_tile = 256 if co_p % 256 == 0 else 128
        # Zero-pad: 1-px spatial halo, ragged-row filler to H_t, channels to ci_p.
        xp = jnp.pad(x[:, :H],
                     ((0, 0), (1, 1 + (H_t - H)), (1, 1), (0, ci_p - ci)))
        x = conv3x3_pallas(xp, w9, b2, H_t=H_t, W=W, cin_p=ci_p, cout_p=co_p,
                           block_rows=br, cout_tile=cout_tile,
                           apply_relu=not last, out_dtype=jnp.bfloat16)

    ak = num_anchors * num_classes
    x = x[:, :H, :, :ak].astype(jnp.float32)        # drop pad rows / pad channels
    # == permute(0, 2, 3, 1).contiguous().view(N, -1, num_classes)
    return x.reshape(N, H * W * num_anchors, num_classes)


# --------------------------------------------------------------------------
# Pure-JAX reference (mimics the kernel's bf16/f32 numerics)
# --------------------------------------------------------------------------
def reference_forward(x_nchw, ref_params, num_anchors, num_classes):
    x = jnp.transpose(x_nchw, (0, 2, 3, 1)).astype(jnp.float32)
    n_layers = len(ref_params)
    for i, (w, b) in enumerate(ref_params):
        y = jax.lax.conv_general_dilated(
            x.astype(jnp.bfloat16), w.astype(jnp.bfloat16),
            window_strides=(1, 1), padding=((1, 1), (1, 1)),
            dimension_numbers=("NHWC", "HWIO", "NHWC"),
            preferred_element_type=jnp.float32)
        y = y + b
        x = jnp.maximum(y, 0.0) if i < n_layers - 1 else y
    N, H, W, _ = x.shape
    return x.reshape(N, H * W * num_anchors, num_classes)


if __name__ == "__main__":
    # Small, module-consistent shapes (channels scaled down from 256).
    batch = 2
    fpn_channels = 32          # stands in for fpn_output_channels=256
    classify_channels = 32     # stands in for classify_channels=256
    num_anchors = 3            # module default is 9
    num_classes = 8            # module default is 80
    H = W = 16

    key = jax.random.PRNGKey(0)
    key, kx = jax.random.split(key)
    x = jax.random.normal(kx, (batch, fpn_channels, H, W), jnp.float32)  # NCHW

    kernel_params, ref_params = make_params(
        key, fpn_channels, classify_channels, num_anchors, num_classes)

    out = classification_head_forward(
        x, kernel_params, num_anchors, num_classes, block_rows=8)
    out = jax.block_until_ready(out)

    expected = (batch, H * W * num_anchors, num_classes)
    assert out.shape == expected, (out.shape, expected)
    assert bool(jnp.all(jnp.isfinite(out)))

    # Correctness vs a pure-JAX reference with matching bf16/f32 numerics.
    ref = reference_forward(x, ref_params, num_anchors, num_classes)
    rel_err = float(jnp.max(jnp.abs(out - ref)) /
                    (jnp.max(jnp.abs(ref)) + 1e-6))
    assert rel_err < 5e-2, rel_err

    print("KERNEL_OK")
</pallas_src>

<mosaic_0001>
module attributes {stable_mosaic.version = 11 : i64} {
  func.func @_conv3x3_kernel(%arg0: i32, %arg1: i32, %arg2: i32, %arg3: memref<1x18x18x128xbf16, #tpu.memory_space<vmem>>, %arg4: memref<9x128x128xbf16, #tpu.memory_space<vmem>>, %arg5: memref<1x128xf32, #tpu.memory_space<vmem>>, %arg6: memref<1x8x16x128xbf16, #tpu.memory_space<vmem>>) attributes {dimension_semantics = [#tpu.dimension_semantics<parallel>, #tpu.dimension_semantics<parallel>, #tpu.dimension_semantics<parallel>], iteration_bounds = array<i64: 2, 1, 2>, scalar_prefetch = 0 : i64, scratch_operands = 0 : i64, tpu.core_type = #tpu.core_type<tc>, window_params = [{transform_indices = @transform_0, window_bounds = array<i64: 1, 18, 18, 128>}, {transform_indices = @transform_1, window_bounds = array<i64: 9, 128, 128>}, {transform_indices = @transform_2, window_bounds = array<i64: 1, 128>}, {transform_indices = @transform_3, window_bounds = array<i64: 1, 8, 16, 128>}]} {
    %c8_i32 = arith.constant 8 : i32
    %0 = arith.muli %arg2, %c8_i32 : i32
    %1 = tpu.assume_multiple %0, 8 : i32
    %cst = arith.constant 0.000000e+00 : f32
    %2 = vector.broadcast %cst : f32 to vector<128x128xf32>
    %c0_i32 = arith.constant 0 : i32
    %3 = arith.addi %1, %c0_i32 : i32
    %c0 = arith.constant 0 : index
    %4 = arith.index_cast %3 : i32 to index
    %c0_0 = arith.constant 0 : index
    %c0_1 = arith.constant 0 : index
    %5 = vector.load %arg3[%c0, %4, %c0_0, %c0_1] : memref<1x18x18x128xbf16, #tpu.memory_space<vmem>>, vector<1x8x18x128xbf16>
    %6 = vector.shape_cast %5 : vector<1x8x18x128xbf16> to vector<8x18x128xbf16>
    %7 = vector.extract_strided_slice %6 {offsets = [0, 0, 0], sizes = [8, 16, 128], strides = [1, 1, 1]} : vector<8x18x128xbf16> to vector<8x16x128xbf16>
    %8 = vector.shape_cast %7 : vector<8x16x128xbf16> to vector<128x128xbf16>
    %c0_2 = arith.constant 0 : index
    %c0_3 = arith.constant 0 : index
    %c0_4 = arith.constant 0 : index
    %9 = vector.load %arg4[%c0_2, %c0_3, %c0_4] : memref<9x128x128xbf16, #tpu.memory_space<vmem>>, vector<1x128x128xbf16>
    %10 = vector.shape_cast %9 : vector<1x128x128xbf16> to vector<128x128xbf16>
    %cst_5 = arith.constant dense<0.000000e+00> : vector<128x128xf32>
    %11 = tpu.matmul %8, %10, %cst_5 {dimension_numbers = #tpu.dot_dimension_numbers<[1], [0], [0], [1], [0, 0, 1, 1], [], []>} : vector<128x128xbf16>, vector<128x128xbf16>, vector<128x128xf32> -> vector<128x128xf32>
    %12 = arith.addf %2, %11 : vector<128x128xf32>
    %13 = vector.extract_strided_slice %6 {offsets = [0, 1, 0], sizes = [8, 16, 128], strides = [1, 1, 1]} : vector<8x18x128xbf16> to vector<8x16x128xbf16>
    %14 = vector.shape_cast %13 : vector<8x16x128xbf16> to vector<128x128xbf16>
    %c1 = arith.constant 1 : index
    %c0_6 = arith.constant 0 : index
    %c0_7 = arith.constant 0 : index
    %15 = vector.load %arg4[%c1, %c0_6, %c0_7] : memref<9x128x128xbf16, #tpu.memory_space<vmem>>, vector<1x128x128xbf16>
    %16 = vector.shape_cast %15 : vector<1x128x128xbf16> to vector<128x128xbf16>
    %cst_8 = arith.constant dense<0.000000e+00> : vector<128x128xf32>
    %17 = tpu.matmul %14, %16, %cst_8 {dimension_numbers = #tpu.dot_dimension_numbers<[1], [0], [0], [1], [0, 0, 1, 1], [], []>} : vector<128x128xbf16>, vector<128x128xbf16>, vector<128x128xf32> -> vector<128x128xf32>
    %18 = arith.addf %12, %17 : vector<128x128xf32>
    %19 = vector.extract_strided_slice %6 {offsets = [0, 2, 0], sizes = [8, 16, 128], strides = [1, 1, 1]} : vector<8x18x128xbf16> to vector<8x16x128xbf16>
    %20 = vector.shape_cast %19 : vector<8x16x128xbf16> to vector<128x128xbf16>
    %c2 = arith.constant 2 : index
    %c0_9 = arith.constant 0 : index
    %c0_10 = arith.constant 0 : index
    %21 = vector.load %arg4[%c2, %c0_9, %c0_10] : memref<9x128x128xbf16, #tpu.memory_space<vmem>>, vector<1x128x128xbf16>
    %22 = vector.shape_cast %21 : vector<1x128x128xbf16> to vector<128x128xbf16>
    %cst_11 = arith.constant dense<0.000000e+00> : vector<128x128xf32>
    %23 = tpu.matmul %20, %22, %cst_11 {dimension_numbers = #tpu.dot_dimension_numbers<[1], [0], [0], [1], [0, 0, 1, 1], [], []>} : vector<128x128xbf16>, vector<128x128xbf16>, vector<128x128xf32> -> vector<128x128xf32>
    %24 = arith.addf %18, %23 : vector<128x128xf32>
    %c1_i32 = arith.constant 1 : i32
    %25 = arith.addi %1, %c1_i32 : i32
    %c0_12 = arith.constant 0 : index
    %26 = arith.index_cast %25 : i32 to index
    %c0_13 = arith.constant 0 : index
    %c0_14 = arith.constant 0 : index
    %27 = vector.load %arg3[%c0_12, %26, %c0_13, %c0_14] : memref<1x18x18x128xbf16, #tpu.memory_space<vmem>>, vector<1x8x18x128xbf16>
    %28 = vector.shape_cast %27 : vector<1x8x18x128xbf16> to vector<8x18x128xbf16>
    %29 = vector.extract_strided_slice %28 {offsets = [0, 0, 0], sizes = [8, 16, 128], strides = [1, 1, 1]} : vector<8x18x128xbf16> to vector<8x16x128xbf16>
    %30 = vector.shape_cast %29 : vector<8x16x128xbf16> to vector<128x128xbf16>
    %c3 = arith.constant 3 : index
    %c0_15 = arith.constant 0 : index
    %c0_16 = arith.constant 0 : index
    %31 = vector.load %arg4[%c3, %c0_15, %c0_16] : memref<9x128x128xbf16, #tpu.memory_space<vmem>>, vector<1x128x128xbf16>
    %32 = vector.shape_cast %31 : vector<1x128x128xbf16> to vector<128x128xbf16>
    %cst_17 = arith.constant dense<0.000000e+00> : vector<128x128xf32>
    %33 = tpu.matmul %30, %32, %cst_17 {dimension_numbers = #tpu.dot_dimension_numbers<[1], [0], [0], [1], [0, 0, 1, 1], [], []>} : vector<128x128xbf16>, vector<128x128xbf16>, vector<128x128xf32> -> vector<128x128xf32>
    %34 = arith.addf %24, %33 : vector<128x128xf32>
    %35 = vector.extract_strided_slice %28 {offsets = [0, 1, 0], sizes = [8, 16, 128], strides = [1, 1, 1]} : vector<8x18x128xbf16> to vector<8x16x128xbf16>
    %36 = vector.shape_cast %35 : vector<8x16x128xbf16> to vector<128x128xbf16>
    %c4 = arith.constant 4 : index
    %c0_18 = arith.constant 0 : index
    %c0_19 = arith.constant 0 : index
    %37 = vector.load %arg4[%c4, %c0_18, %c0_19] : memref<9x128x128xbf16, #tpu.memory_space<vmem>>, vector<1x128x128xbf16>
    %38 = vector.shape_cast %37 : vector<1x128x128xbf16> to vector<128x128xbf16>
    %cst_20 = arith.constant dense<0.000000e+00> : vector<128x128xf32>
    %39 = tpu.matmul %36, %38, %cst_20 {dimension_numbers = #tpu.dot_dimension_numbers<[1], [0], [0], [1], [0, 0, 1, 1], [], []>} : vector<128x128xbf16>, vector<128x128xbf16>, vector<128x128xf32> -> vector<128x128xf32>
    %40 = arith.addf %34, %39 : vector<128x128xf32>
    %41 = vector.extract_strided_slice %28 {offsets = [0, 2, 0], sizes = [8, 16, 128], strides = [1, 1, 1]} : vector<8x18x128xbf16> to vector<8x16x128xbf16>
    %42 = vector.shape_cast %41 : vector<8x16x128xbf16> to vector<128x128xbf16>
    %c5 = arith.constant 5 : index
    %c0_21 = arith.constant 0 : index
    %c0_22 = arith.constant 0 : index
    %43 = vector.load %arg4[%c5, %c0_21, %c0_22] : memref<9x128x128xbf16, #tpu.memory_space<vmem>>, vector<1x128x128xbf16>
    %44 = vector.shape_cast %43 : vector<1x128x128xbf16> to vector<128x128xbf16>
    %cst_23 = arith.constant dense<0.000000e+00> : vector<128x128xf32>
    %45 = tpu.matmul %42, %44, %cst_23 {dimension_numbers = #tpu.dot_dimension_numbers<[1], [0], [0], [1], [0, 0, 1, 1], [], []>} : vector<128x128xbf16>, vector<128x128xbf16>, vector<128x128xf32> -> vector<128x128xf32>
    %46 = arith.addf %40, %45 : vector<128x128xf32>
    %c2_i32 = arith.constant 2 : i32
    %47 = arith.addi %1, %c2_i32 : i32
    %c0_24 = arith.constant 0 : index
    %48 = arith.index_cast %47 : i32 to index
    %c0_25 = arith.constant 0 : index
    %c0_26 = arith.constant 0 : index
    %49 = vector.load %arg3[%c0_24, %48, %c0_25, %c0_26] : memref<1x18x18x128xbf16, #tpu.memory_space<vmem>>, vector<1x8x18x128xbf16>
    %50 = vector.shape_cast %49 : vector<1x8x18x128xbf16> to vector<8x18x128xbf16>
    %51 = vector.extract_strided_slice %50 {offsets = [0, 0, 0], sizes = [8, 16, 128], strides = [1, 1, 1]} : vector<8x18x128xbf16> to vector<8x16x128xbf16>
    %52 = vector.shape_cast %51 : vector<8x16x128xbf16> to vector<128x128xbf16>
    %c6 = arith.constant 6 : index
    %c0_27 = arith.constant 0 : index
    %c0_28 = arith.constant 0 : index
    %53 = vector.load %arg4[%c6, %c0_27, %c0_28] : memref<9x128x128xbf16, #tpu.memory_space<vmem>>, vector<1x128x128xbf16>
    %54 = vector.shape_cast %53 : vector<1x128x128xbf16> to vector<128x128xbf16>
    %cst_29 = arith.constant dense<0.000000e+00> : vector<128x128xf32>
    %55 = tpu.matmul %52, %54, %cst_29 {dimension_numbers = #tpu.dot_dimension_numbers<[1], [0], [0], [1], [0, 0, 1, 1], [], []>} : vector<128x128xbf16>, vector<128x128xbf16>, vector<128x128xf32> -> vector<128x128xf32>
    %56 = arith.addf %46, %55 : vector<128x128xf32>
    %57 = vector.extract_strided_slice %50 {offsets = [0, 1, 0], sizes = [8, 16, 128], strides = [1, 1, 1]} : vector<8x18x128xbf16> to vector<8x16x128xbf16>
    %58 = vector.shape_cast %57 : vector<8x16x128xbf16> to vector<128x128xbf16>
    %c7 = arith.constant 7 : index
    %c0_30 = arith.constant 0 : index
    %c0_31 = arith.constant 0 : index
    %59 = vector.load %arg4[%c7, %c0_30, %c0_31] : memref<9x128x128xbf16, #tpu.memory_space<vmem>>, vector<1x128x128xbf16>
    %60 = vector.shape_cast %59 : vector<1x128x128xbf16> to vector<128x128xbf16>
    %cst_32 = arith.constant dense<0.000000e+00> : vector<128x128xf32>
    %61 = tpu.matmul %58, %60, %cst_32 {dimension_numbers = #tpu.dot_dimension_numbers<[1], [0], [0], [1], [0, 0, 1, 1], [], []>} : vector<128x128xbf16>, vector<128x128xbf16>, vector<128x128xf32> -> vector<128x128xf32>
    %62 = arith.addf %56, %61 : vector<128x128xf32>
    %63 = vector.extract_strided_slice %50 {offsets = [0, 2, 0], sizes = [8, 16, 128], strides = [1, 1, 1]} : vector<8x18x128xbf16> to vector<8x16x128xbf16>
    %64 = vector.shape_cast %63 : vector<8x16x128xbf16> to vector<128x128xbf16>
    %c8 = arith.constant 8 : index
    %c0_33 = arith.constant 0 : index
    %c0_34 = arith.constant 0 : index
    %65 = vector.load %arg4[%c8, %c0_33, %c0_34] : memref<9x128x128xbf16, #tpu.memory_space<vmem>>, vector<1x128x128xbf16>
    %66 = vector.shape_cast %65 : vector<1x128x128xbf16> to vector<128x128xbf16>
    %cst_35 = arith.constant dense<0.000000e+00> : vector<128x128xf32>
    %67 = tpu.matmul %64, %66, %cst_35 {dimension_numbers = #tpu.dot_dimension_numbers<[1], [0], [0], [1], [0, 0, 1, 1], [], []>} : vector<128x128xbf16>, vector<128x128xbf16>, vector<128x128xf32> -> vector<128x128xf32>
    %68 = arith.addf %62, %67 : vector<128x128xf32>
    %c0_36 = arith.constant 0 : index
    %c0_37 = arith.constant 0 : index
    %69 = vector.load %arg5[%c0_36, %c0_37] : memref<1x128xf32, #tpu.memory_space<vmem>>, vector<1x128xf32>
    %70 = vector.broadcast %69 : vector<1x128xf32> to vector<128x128xf32>
    %71 = arith.addf %68, %70 : vector<128x128xf32>
    %cst_38 = arith.constant 0.000000e+00 : f32
    %72 = vector.broadcast %cst_38 : f32 to vector<128x128xf32>
    %73 = arith.maximumf %71, %72 : vector<128x128xf32>
    %74 = vector.shape_cast %73 : vector<128x128xf32> to vector<8x16x128xf32>
    %75 = arith.truncf %74 : vector<8x16x128xf32> to vector<8x16x128xbf16>
    %c0_39 = arith.constant 0 : index
    %c0_40 = arith.constant 0 : index
    %c0_41 = arith.constant 0 : index
    %c0_42 = arith.constant 0 : index
    %76 = vector.load %arg6[%c0_39, %c0_40, %c0_41, %c0_42] : memref<1x8x16x128xbf16, #tpu.memory_space<vmem>>, vector<1x8x16x128xbf16>
    %77 = vector.shape_cast %76 : vector<1x8x16x128xbf16> to vector<8x16x128xbf16>
    %78 = vector.shape_cast %75 : vector<8x16x128xbf16> to vector<1x8x16x128xbf16>
    tpu.vector_store %arg6[%c0_39, %c0_40, %c0_41, %c0_42], %78 {strides = array<i32>} : memref<1x8x16x128xbf16, #tpu.memory_space<vmem>>, vector<1x8x16x128xbf16>,
    return
  }
  func.func @transform_0(%arg0: i32, %arg1: i32, %arg2: i32) -> (i32, i32, i32, i32) {
    %c0_i32 = arith.constant 0 : i32
    %c0_i32_0 = arith.constant 0 : i32
    %c0_i32_1 = arith.constant 0 : i32
    %c0_i32_2 = arith.constant 0 : i32
    return %arg0, %c0_i32, %c0_i32_0, %c0_i32_1 : i32, i32, i32, i32
  }
  func.func @transform_1(%arg0: i32, %arg1: i32, %arg2: i32) -> (i32, i32, i32) {
    %c0_i32 = arith.constant 0 : i32
    %c0_i32_0 = arith.constant 0 : i32
    %c0_i32_1 = arith.constant 0 : i32
    return %c0_i32, %c0_i32_0, %arg1 : i32, i32, i32
  }
  func.func @transform_2(%arg0: i32, %arg1: i32, %arg2: i32) -> (i32, i32) {
    %c0_i32 = arith.constant 0 : i32
    %c0_i32_0 = arith.constant 0 : i32
    return %c0_i32, %arg1 : i32, i32
  }
  func.func @transform_3(%arg0: i32, %arg1: i32, %arg2: i32) -> (i32, i32, i32, i32) {
    %c0_i32 = arith.constant 0 : i32
    %c0_i32_0 = arith.constant 0 : i32
    return %arg0, %arg2, %c0_i32, %arg1 : i32, i32, i32, i32
  }
}

</mosaic_0001>

<bundles_post_ra>
// kernel: tpu_custom_call.1
= control target key start
LH: loop header
LB: loop body
LE: loop exit
PB: predicated region body
PF: predicated region fallthrough
CT: control target
= control target key end

     0   :  { %8 = vsyncpa [#allocation3], 0  ;;  %s5734_s0 = inlined_call_operand.vmem [shape: bf16[2,18,18,128], index: 0, kind: input, shape index: {}]   ;;  %s5735_s1 = inlined_call_operand.vmem [shape: bf16[9,128,128], index: 1, kind: input, shape index: {}]   ;;  %s5736_s2 = inlined_call_operand.vmem [shape: f32[1,128], index: 2, kind: input, shape index: {}]   ;;  %s5737_s3 = inlined_call_operand.hbm [shape: bf16[2,16,16,128], index: 3, kind: output, shape index: {}]  }
   0x1   :  { %10 = vsyncpa [#allocation3 + $0x1], 0  ;;  %s4578_s12 = smov 0   ;;  %s4580_s13 = smov 0  }
   0x2   :  { %s4582_s14 = smov 0   ;;  %s4584_s15 = smov 0  }
   0x3   :  { %s4586_s16 = smov 0   ;;  %s4588_s17 = smov 0  }
   0x4   :  { %s4590_s18 = smov 0   ;;  %s4592_s19 = smov 0  }
   0x5 LB: > { %s3242_s20 = sadd.s32 4294967295, %s4553_s19   ;;  %s3243_s21 = sadd.s32 4294967294, %s4553_s19   ;;  %s4553_s19 = sphi %s4592_s19, %s16_s19   ;;  %s4549_s18 = sphi %s4590_s18, %s5782_s18   ;;  %s4545_s17 = sphi %s4588_s17, %s5781_s17   ;;  %s4541_s16 = sphi %s4586_s16, %s5780_s16   ;;  %s4537_s15 = sphi %s4584_s15, %s5779_s15   ;;  %s4533_s14 = sphi %s4582_s14, %s5778_s14   ;;  %s4529_s13 = sphi %s4580_s13, %s5777_s13   ;;  %s4525_s12 = sphi %s4578_s12, %s5776_s12  }
   0x6   : > { %s28_s22 = sadd.s32 1, %s4545_s17  ;;  %s35_s23 = sadd.s32 1, %s4549_s18 }
   0x7   : > { %p29_p0 = scmp.ge.s32.totalorder %s28_s22, 2  ;;  %p134_p1 = scmp.ne.s32.totalorder %s4533_s14, %s4529_s13 }
   0x8   : > { %p135_p2 = scmp.eq.s32.totalorder %s3242_s20, 3  ;;  %p140_p5 = scmp.ne.s32.totalorder %s4529_s13, %s4525_s12 }
   0x9   : > { %s5784_s22 = smov (%p29_p0, %s28_s22), 0  ;;  %s5786_s23 = smov (!%p29_p0, %s35_s23), %s4549_s18 }
   0xa   : > { %s118_s24 = ssub.s32 %s4545_s17, %s5784_s22  ;;  %p4629_p3 = por %p135_p2, %p134_p1 }
   0xb   : > { %p37_p4 = scmp.ge.s32.totalorder %s5786_s23, 2  ;;  %p141_p6 = scmp.eq.s32.totalorder %s3243_s21, 3 }
   0xc   : > { %p3248_p7 = scmp.ge.s32.totalorder %s4553_s19, 1  ;;  %p180_p9 = scmp.lt.s32.totalorder %s4553_s19, 5 }
   0xd   : > { %s5788_s23 = smov (%p37_p4, %s5786_s23), 0  ;;  %p4638_p8 = por %p141_p6, %p140_p5 }
   0xe   : > { %s117_s27 = ssub.s32 %s4549_s18, %s5788_s23  ;;  %s124_s28 = sadd.s32 1, %s4533_s14 }
   0xf   : > { %s119_s29 = sor.u32 %s118_s24, %s117_s27  ;;  %p181_p10 = pnand %p3248_p7, %p180_p9 }
  0x10   : > { %p122_p11 = scmp.eq.s32.totalorder %s119_s29, 0 }
  0x11   : > { %184 = sbr.rel (%p181_p10) target bundleno = 459 (0x1cb), region = 32 }
  0x12   : > { %s4647_s30 = scalar_select %p122_p11, %s4533_s14, %s124_s28  }
  0x18   : > { %v4341_v0 = vld [vmem:[%s5735_s1 + $0x40] sm:$0xff]   ;;  %p211_p12 = scmp.lt.s32.totalorder %s4541_s16, 1  ;;  %v4343_v2 = vld [vmem:[%s5735_s1 + $0x48] sm:$0xff]   ;;  %v4345_v4 = vld [vmem:[%s5735_s1 + $0x50] sm:$0xff]   ;;  %s3626_s8 = smul.u32 96, %s4537_s15  ;;  %vm859_vm3 = vcmask 1042432  }
  0x19   : > { %v4342_v1 = vld [vmem:[%s5735_s1 + $0x100] sm:$0xff]   ;;  %3835 = vmatprep.subr.bf16.mxu1 %v4341_v0  ;;  %v4344_v3 = vld [vmem:[%s5735_s1 + $0x108] sm:$0xff]   ;;  %v4346_v5 = vld [vmem:[%s5735_s1 + $0x110] sm:$0xff]   ;;  %vm269_vm0 = vsmask.f32 3328  ;;  %vm860_vm4 = vcmask 1046532  }
  0x1a   : > { %s212_s10 = scalar_select %p211_p12, %s4541_s16, 1  ;;  %3963 = vmatprep.subr.bf16.mxu0 %v4342_v1  ;;  %3836 = vmatpush3.bf16.msra.mxu1 %v4341_v0  ;;  %v4347_v6 = vld [vmem:[%s5735_s1 + $0x58] sm:$0xff]   ;;  %v4349_v8 = vld [vmem:[%s5735_s1 + $0x60] sm:$0xff]   ;;  %v4351_v10 = vld [vmem:[%s5735_s1 + $0x68] sm:$0xff]   ;;  %vm270_vm1 = vsmask.f32 7440 }
  0x1b   : > { %3964 = vmatpush3.bf16.msra.mxu0 %v4342_v1  ;;  %3837 = vmatprep.subr.bf16.mxu1 %v4343_v2  ;;  %v4348_v7 = vld [vmem:[%s5735_s1 + $0x118] sm:$0xff]   ;;  %v4350_v9 = vld [vmem:[%s5735_s1 + $0x120] sm:$0xff]   ;;  %v4352_v11 = vld [vmem:[%s5735_s1 + $0x128] sm:$0xff]   ;;  %s3643_s24 = sshll.u32 %s4537_s15, 4  ;;  %s3622_s27 = sshll.u32 %s4541_s16, 5 }
  0x1c   : > { %3965 = vmatprep.subr.bf16.mxu0 %v4344_v3  ;;  %s4267_s29 = smul.u32 216, %s212_s10  ;;  %v4353_v25 = vld [vmem:[%s5735_s1 + $0x70] sm:$0xff]   ;;  %v4355_v35 = vld [vmem:[%s5735_s1 + $0x78] sm:$0xff]   ;;  %vm4731_vm2 = vmor %vm269_vm0, %vm270_vm1  ;;  %s3122_s15 = sadd.s32 %s3643_s24, %s3622_s27 }
  0x1d   : > { %v4354_v29 = vld [vmem:[%s5735_s1 + $0x130] sm:$0xff]   ;;  %v4356_v50 = vld [vmem:[%s5735_s1 + $0x138] sm:$0xff]   ;;  %vm5048_vm5 = vmor %vm859_vm3, %vm860_vm4  ;;  %s3623_s16 = sshll.u32 %s3122_s15, 6 }
  0x1e   : > { %3838 = vmatpush3.bf16.msra.mxu1 %v4343_v2  ;;  %s215_s20 = scalar_lea.vmem %s5734_s0, %s4267_s29  ;;  %v4357_v2 = vld [vmem:[%s5735_s1] sm:$0xff]   ;;  %v4436_v36 = vld [vmem:[%s5735_s1 + $0x238] sm:$0xff]   ;;  %s5674_s29 = scalar_lea.hbm %s5737_s3, %s3623_s16 }
  0x1f   : > { %3966 = vmatpush3.bf16.msra.mxu0 %v4344_v3  ;;  %3839 = vmatprep.subr.bf16.mxu1 %v4345_v4  ;;  %s4685_s28 = scalar_lea.vmem %s215_s20, %s3626_s8  ;;  %v4763_v3 = vld [vmem:[%s5735_s1 + $0x140] sm:$0xff]   ;;  %s208_s20 = sand.u32 1, %s4529_s13  }
  0x20   : > { %3967 = vmatprep.subr.bf16.mxu0 %v4346_v5  ;;  %v4694_v12 = vld [vmem:[%s4685_s28] sm:$0xf]  ;;  %v4697_v13 = vld [vmem:[%s4685_s28 + $0x4] sm:$0xf]  ;;  %v231_v14 = vld [vmem:[%s4685_s28 + $0x8] sm:$0x1] }
  0x21   : > { %v273_v15 = vshrl.u32 %v4694_v12, 16  ;;  %v276_v16 = vshll.u32 %v4694_v12, 16  ;;  %v282_v17 = vshll.u32 %v4697_v13, 16  ;;  %v286_v18 = vshrl.u32 %v4697_v13, 16  ;;  %v4705_v20 = vld [vmem:[%s4685_s28 + $0xc] sm:$0xf] }
  0x22   : > { %3840 = vmatpush3.bf16.msra.mxu1 %v4345_v4  ;;  %v292_v19 = vshll.u32 %v231_v14, 16  ;;  %v4708_v23 = vld [vmem:[%s4685_s28 + $0x10] sm:$0xf]  ;;  %v4711_v24 = vld [vmem:[%s4685_s28 + $0x14] sm:$0x1]  ;;  %v1383_v28 = vshrl.u32 %v4705_v20, 16 }
  0x23   : > { %3968 = vmatpush3.bf16.msra.mxu0 %v4346_v5  ;;  %3841 = vmatprep.subr.bf16.mxu1 %v4347_v6  ;;  %v275_v21 = vrot.slane %v273_v15, 4  ;;  %v278_v22 = vrot.slane %v276_v16, 5  ;;  %v284_v26 = vrot.slane %v282_v17, 5  ;;  %v288_v27 = vrot.slane %v286_v18, 4  ;;  %v4724_v34 = vld [vmem:[%s4685_s28 + $0xc] sm:$0xf] }
  0x24   : > { %3969 = vmatprep.subr.bf16.mxu0 %v4348_v7  ;;  %v1386_v31 = vshll.u32 %v4705_v20, 16  ;;  %v1392_v32 = vshll.u32 %v4708_v23, 16  ;;  %v1396_v33 = vshrl.u32 %v4708_v23, 16  ;;  %v294_v38 = vrot.slane %v292_v19, 5  ;;  %v4737_v41 = vld [vmem:[%s4685_s28 + $0x10] sm:$0xf] }
  0x25   : > { %v279_v30 = vor.u32 %v278_v22, %v275_v21  ;;  %v289_v37 = vor.u32 %v288_v27, %v284_v26  ;;  %v1385_v39 = vrot.slane %v1383_v28, 4  ;;  %v1402_v40 = vshll.u32 %v4711_v24, 16  ;;  %v234_v54 = vld [vmem:[%s4685_s28 + $0x14] sm:$0x1]  ;;  %v4749_v56 = vld [vmem:[%s4685_s28 + $0x18] sm:$0xf] }
  0x26   : > { %3842 = vmatpush3.bf16.msra.mxu1 %v4347_v6  ;;  %v1388_v43 = vrot.slane %v1386_v31, 5  ;;  %v1394_v44 = vrot.slane %v1392_v32, 5  ;;  %v1398_v45 = vrot.slane %v1396_v33, 4  ;;  %v297_v48 = vshrl.u32 %v4724_v34, 16  ;;  %v4755_v61 = vld [vmem:[%s4685_s28 + $0x1c] sm:$0xf] }
  0x27   : > { %3970 = vmatpush3.bf16.msra.mxu0 %v4348_v7  ;;  %3843 = vmatprep.subr.bf16.mxu1 %v4349_v8  ;;  %v280_v42 = vrot.slane %v279_v30, 4  ;;  %v290_v46 = vrot.slane %v289_v37, 4  ;;  %v1404_v47 = vrot.slane %v1402_v40, 5  ;;  %v300_v49 = vshll.u32 %v4724_v34, 16  ;;  %v4766_v7 = vld [vmem:[%s4685_s28 + $0x20] sm:$0x1] }
  0x28   : > { %3971 = vmatprep.subr.bf16.mxu0 %v4350_v9  ;;  %v1389_v52 = vor.u32 %v1388_v43, %v1385_v39  ;;  %v1399_v53 = vor.u32 %v1398_v45, %v1394_v44  ;;  %v306_v55 = vshll.u32 %v4737_v41, 16  ;;  %v299_v58 = vrot.slane %v297_v48, 4  ;;  %v4786_v31 = vld [vmem:[%s4685_s28 + $0x1c] sm:$0xf]  ;;  %v237_v37 = vld [vmem:[%s4685_s28 + $0x20] sm:$0x1] }
  0x29   : > { %v285_v51 = vsel %vm4731_vm2, %v280_v42, %v284_v26  ;;  %v295_v57 = vsel %vm4731_vm2, %v290_v46, %v294_v38  ;;  %v302_v59 = vrot.slane %v300_v49, 5  ;;  %v310_v60 = vshrl.u32 %v4737_v41, 16  ;;  %v4779_v26 = vld [vmem:[%s4685_s28 + $0x18] sm:$0xf]  ;;  %v4359_v48 = vld [vmem:[%s5735_s1 + $0x8] sm:$0xff]   ;;  %s3249_s10 = sshll.u32 %s208_s20, 6 }
  0x2a   : > { %3844 = vmatpush3.bf16.msra.mxu1 %v4349_v8  ;;  %v3270_v62 = vcombine.low %v285_v51, %v295_v57  ;;  %v1390_v63 = vrot.slane %v1389_v52, 4  ;;  %v1400_v0 = vrot.slane %v1399_v53, 4  ;;  %v308_v1 = vrot.slane %v306_v55, 5  ;;  %v4806_v55 = vld [vmem:[%s4685_s28 + $0x2c] sm:$0x1]  ;;  %s5648_s21 = scalar_lea.vmem [#allocation2], %s3249_s10 }
  0x2b   : > { %3972 = vmatpush3.bf16.msra.mxu0 %v4350_v9  ;;  %3845 = vmatprep.subr.bf16.mxu1 %v4351_v10  ;;  %v303_v4 = vor.u32 %v302_v59, %v299_v58  ;;  %v312_v5 = vrot.slane %v310_v60, 4  ;;  %v316_v6 = vshll.u32 %v234_v54, 16  ;;  %v1410_v14 = vshll.u32 %v4749_v56, 16  ;;  %s3125_s4 = sshll.u32 %s5648_s21, 4  ;;  %s5682_s6 = scalar_lea.sflag [#allocation3], %s208_s20  ;;  %s5676_s4 = int_to_ptr.vmem [resolvable:$true] %s3125_s4 }
  0x2c   : > { %3973 = vmatprep.subr.bf16.mxu0 %v4352_v11  ;;  %3851 = vmatprep.mubr.bf16.mxu1 %v3270_v62  ;;  %v1395_v9 = vsel %vm4731_vm2, %v1390_v63, %v1394_v44  ;;  %v1416_v22 = vshll.u32 %v4755_v61, 16  ;;  %v1426_v30 = vshll.u32 %v4766_v7, 16  ;;  %v321_v38 = vshrl.u32 %v4779_v26, 16  ;;  %v4796_v44 = vld [vmem:[%s4685_s28 + $0x24] sm:$0xf]  ;;  %v4360_v63 = vld [vmem:[%s5735_s1 + $0x148] sm:$0xff]  }
  0x2d   : > { %v304_v16 = vrot.slane %v303_v4, 4  ;;  %v313_v17 = vor.u32 %v312_v5, %v308_v1  ;;  %v318_v18 = vrot.slane %v316_v6, 5  ;;  %v1412_v21 = vrot.slane %v1410_v14, 5  ;;  %v4813_v62 = vld [vmem:[%s4685_s28 + $0x24] sm:$0xf]  ;;  %v4361_v14 = vld [vmem:[%s5735_s1 + $0x10] sm:$0xff]  }
  0x2e   : > { %3846 = vmatpush3.bf16.msra.mxu1 %v4351_v10  ;;  %v1405_v10 = vsel %vm4731_vm2, %v1400_v0, %v1404_v47  ;;  %v1418_v33 = vrot.slane %v1416_v22, 5  ;;  %v1428_v40 = vrot.slane %v1426_v30, 5  ;;  %v324_v42 = vshll.u32 %v4779_v26, 16  ;;  %v4820_v6 = vld [vmem:[%s4685_s28 + $0x28] sm:$0xf]  ;;  %s4459_s7 = scalar_lea.vmem %s5676_s4, 1024 }
  0x2f   : > { %3974 = vmatpush3.bf16.msra.mxu0 %v4352_v11  ;;  %3847 = vmatprep.subr.bf16.mxu1 %v4353_v25  ;;  %v1407_v11 = vshrl.u32 %v4749_v56, 16  ;;  %v3416_v15 = vcombine.low %v1395_v9, %v1405_v10  ;;  %v309_v28 = vsel %vm4731_vm2, %v304_v16, %v308_v1  ;;  %v330_v43 = vshll.u32 %v4786_v31, 16  ;;  %p4460_p13 = scmp.ne.s32.totalorder %s5676_s4, %s4459_s7  ;;  %s4555_s8 = smov [#allocation2]  }
  0x30   : > { %3975 = vmatprep.subr.bf16.mxu0 %v4354_v29  ;;  %v323_v49 = vrot.slane %v321_v38, 4  ;;  %v326_v51 = vrot.slane %v324_v42, 5  ;;  %v334_v53 = vshrl.u32 %v4786_v31, 16  ;;  %v340_v54 = vshll.u32 %v237_v37, 16  ;;  %v4839_v37 = vld [vmem:[%s4685_s28 + $0x34] sm:$0xf] }
  0x31   : > { %v1409_v19 = vrot.slane %v1407_v11, 4  ;;  %3979 = vmatprep.mubr.bf16.mxu0 %v3416_v15  ;;  %v332_v52 = vrot.slane %v330_v43, 5  ;;  %v1431_v59 = vshrl.u32 %v4796_v44, 16  ;;  %v1434_v60 = vshll.u32 %v4796_v44, 16  ;;  %v4362_v43 = vld [vmem:[%s5735_s1 + $0x150] sm:$0xff]   ;;  %p4461_p0 = pnand %p4460_p13, %p4629_p3  ;;  %s4463_s9 = sshll.u32 %s4555_s8, 4  ;;  %s4464_s9 = int_to_ptr.vmem [resolvable:$false] %s4463_s9 }
  0x32   : > { %3848 = vmatpush3.bf16.msra.mxu1 %v4353_v25  ;;  %v1420_v25 = vshrl.u32 %v4755_v61, 16  ;;  %v327_v0 = vor.u32 %v326_v51, %v323_v49  ;;  %v336_v1 = vrot.slane %v334_v53, 4  ;;  %v342_v4 = vrot.slane %v340_v54, 5  ;;  %v4849_v49 = vld [vmem:[%s4685_s28 + $0x38] sm:$0x1]  ;;  %s4465_s11 = scalar_lea.vmem %s4464_s9, 2048  ;;  %p4466_p2 = scmp.lt.s32.totalorder %s5676_s4, %s4464_s9 }
  0x33   : > { %3976 = vmatpush3.bf16.msra.mxu0 %v4354_v29  ;;  %3849 = vmatprep.subr.bf16.mxu1 %v4355_v35  ;;  %v314_v29 = vrot.slane %v313_v17, 4  ;;  %v1413_v32 = vor.u32 %v1412_v21, %v1409_v19  ;;  %v1433_v10 = vrot.slane %v1431_v59, 4  ;;  %v1436_v11 = vrot.slane %v1434_v60, 5  ;;  %v240_v19 = vld [vmem:[%s4685_s28 + $0x2c] sm:$0x1]  ;;  %p4462_p1 = pneg %p4461_p0  ;;  %p4467_p4 = scmp.lt.s32.totalorder %s4465_s11, %s4459_s7 }
  0x34   : > { %3977 = vmatprep.subr.bf16.mxu0 %v4356_v50  ;;  %v328_v16 = vrot.slane %v327_v0, 4  ;;  %v337_v17 = vor.u32 %v336_v1, %v332_v52  ;;  %v364_v54 = vshll.u32 %v240_v19, 16  ;;  %v4364_v0 = vld [vmem:[%s5735_s1 + $0x158] sm:$0xff]  }
  0x35   : > { %v319_v39 = vsel %vm4731_vm2, %v314_v29, %v318_v18  ;;  %v1414_v46 = vrot.slane %v1413_v32, 4  ;;  %v1437_v21 = vor.u32 %v1436_v11, %v1433_v10  ;;  %v4832_v29 = vld [vmem:[%s4685_s28 + $0x30] sm:$0xf]  ;;  %v4365_v10 = vld [vmem:[%s5735_s1 + $0x20] sm:$0xff]   ;;  %p4468_p5 = por %p4467_p4, %p4466_p2 }
  0x36   : > { %3850 = vmatpush3.bf16.msra.mxu1 %v4355_v35  ;;  %v1422_v35 = vrot.slane %v1420_v25, 4  ;;  %v3271_v45 = vcombine.low %v309_v28, %v319_v39  ;;  %v1450_v25 = vshll.u32 %v4806_v55, 16  ;;  %v345_v28 = vshrl.u32 %v4813_v62, 16 }
  0x37   : > { %3978 = vmatpush3.bf16.msra.mxu0 %v4356_v50  ;;  %3867 = vmatprep.subr.bf16.mxu1 %v4357_v2  ;;  %v4802_v50 = vld [vmem:[%s4685_s28 + $0x28] sm:$0xf]  ;;  %v1419_v57 = vsel %vm4731_vm2, %v1414_v46, %v1418_v33  ;;  %v333_v30 = vsel %vm4731_vm2, %v328_v16, %v332_v52  ;;  %v338_v32 = vrot.slane %v337_v17, 4  ;;  %v1438_v38 = vrot.slane %v1437_v21, 4  ;;  %v4872_v16 = vld [vmem:[%s4685_s28 + $0x34] sm:$0xf]  ;;  %p4469_p6 = pnand %p4468_p5, %p4462_p1 }
  0x38   : > { %3995 = vmatprep.subr.bf16.mxu0 %v4763_v3  ;;  %v1423_v47 = vor.u32 %v1422_v35, %v1418_v33  ;;  %v1440_v5 = vshll.u32 %v4802_v50, 16  ;;  %v348_v33 = vshll.u32 %v4813_v62, 16  ;;  %v354_v35 = vshll.u32 %v4820_v6, 16 }
  0x39   : > { %3852 = vmatmul.mubr.bf16.vlgmr.msra.gmra.mrb[0].mxu1 %v3271_v45  ;;  %v347_v42 = vrot.slane %v345_v28, 4  ;;  %v343_v45 = vsel %vm4731_vm2, %v338_v32, %v342_v4  ;;  %v1455_v59 = vshrl.u32 %v4832_v29, 16  ;;  %v1458_v60 = vshll.u32 %v4832_v29, 16  ;;  %v4366_v32 = vld [vmem:[%s5735_s1 + $0x160] sm:$0xff]  }
  0x3a   : > { %v1424_v58 = vrot.slane %v1423_v47, 4  ;;  %3868 = vmatpush3.bf16.msra.mxu1 %v4357_v2  ;;  %v1444_v2 = vshrl.u32 %v4802_v50, 16  ;;  %v1442_v18 = vrot.slane %v1440_v5, 5  ;;  %v350_v46 = vrot.slane %v348_v33, 5 }
  0x3b   : > { %3869 = vmatprep.subr.bf16.mxu1 %v4359_v48  ;;  %v356_v47 = vrot.slane %v354_v35, 5  ;;  %v3272_v51 = vcombine.low %v333_v30, %v343_v45  ;;  %v366_v4 = vrot.slane %v364_v54, 5  ;;  %v1464_v5 = vshll.u32 %v4839_v37, 16 }
  0x3c   : > { %v1429_v9 = vsel %vm4731_vm2, %v1424_v58, %v1428_v40  ;;  %v1446_v22 = vrot.slane %v1444_v2, 4  ;;  %v1452_v40 = vrot.slane %v1450_v25, 5  ;;  %v1443_v52 = vsel %vm4731_vm2, %v1438_v38, %v1442_v18 }
  0x3d   : > { %v3417_v15 = vcombine.low %v1419_v57, %v1429_v9  ;;  %v351_v57 = vor.u32 %v350_v46, %v347_v42  ;;  %3855 = vmatprep.mubr.bf16.mxu1 %v3272_v51  ;;  %v1468_v9 = vshrl.u32 %v4839_v37, 16  ;;  %v1460_v17 = vrot.slane %v1458_v60, 5  ;;  %v4887_v42 = vld [vmem:[%s4685_s28 + $0x3c] sm:$0xf] }
  0x3e   : > { %3870 = vmatpush3.bf16.msra.mxu1 %v4359_v48  ;;  %v1447_v39 = vor.u32 %v1446_v22, %v1442_v18  ;;  %v358_v48 = vshrl.u32 %v4820_v6, 16  ;;  %v1466_v18 = vrot.slane %v1464_v5, 5  ;;  %v1474_v21 = vshll.u32 %v4849_v49, 16  ;;  %v4369_v5 = vld [vmem:[%s5735_s1 + $0x30] sm:$0xff]  }
  0x3f   : > { %3980 = vmatmul.mubr.bf16.vlgmr.msra.gmra.mrb[0].mxu0 %v3417_v15  ;;  %3871 = vmatprep.subr.bf16.mxu1 %v4361_v14  ;;  %v352_v2 = vrot.slane %v351_v57, 4  ;;  %v1457_v15 = vrot.slane %v1455_v59, 4  ;;  %v1470_v19 = vrot.slane %v1468_v9, 4  ;;  %v4899_v57 = vld [vmem:[%s4685_s28 + $0x44] sm:$0x1] }
  0x40   : > { %3996 = vmatpush3.bf16.msra.mxu0 %v4763_v3  ;;  %v4363_v3 = vld [vmem:[%s5735_s1 + $0x18] sm:$0xff]   ;;  %v1448_v53 = vrot.slane %v1447_v39, 4  ;;  %v360_v58 = vrot.slane %v358_v48, 4  ;;  %v1476_v38 = vrot.slane %v1474_v21, 5  ;;  %v382_v48 = vshrl.u32 %v4872_v16, 16 }
  0x41   : > { %3997 = vmatprep.subr.bf16.mxu0 %v4360_v63  ;;  %v357_v22 = vsel %vm4731_vm2, %v352_v2, %v356_v47  ;;  %v1461_v33 = vor.u32 %v1460_v17, %v1457_v15  ;;  %v1471_v35 = vor.u32 %v1470_v19, %v1466_v18  ;;  %v4883_v39 = vld [vmem:[%s4685_s28 + $0x38] sm:$0x1]  ;;  %v1482_v2 = vshll.u32 %v4887_v42, 16  ;;  %v4916_v21 = vld [vmem:[%s4685_s28 + $0x40] sm:$0xf] }
  0x42   : > { %3872 = vmatpush3.bf16.msra.mxu1 %v4361_v14  ;;  %v1453_v1 = vsel %vm4731_vm2, %v1448_v53, %v1452_v40  ;;  %v361_v14 = vor.u32 %v360_v58, %v356_v47  ;;  %5752 = vst [vmem:[#allocation5_spill] sm:$0xff] %v4883_v39  ;;  %v378_v40 = vshll.u32 %v4872_v16, 16  ;;  %v384_v59 = vrot.slane %v382_v48, 4 }
  0x43   : > { %v3418_v11 = vcombine.low %v1443_v52, %v1453_v1  ;;  %3873 = vmatprep.subr.bf16.mxu1 %v4363_v3  ;;  %v1462_v52 = vrot.slane %v1461_v33, 4  ;;  %v1472_v53 = vrot.slane %v1471_v35, 4  ;;  %v388_v60 = vshll.u32 %v4883_v39, 16  ;;  %v4926_v33 = vld [vmem:[%s4685_s28 + $0x48] sm:$0xf] }
  0x44   : > { %3998 = vmatpush3.bf16.msra.mxu0 %v4360_v63  ;;  %v4869_v63 = vld [vmem:[%s4685_s28 + $0x30] sm:$0xf]  ;;  %v362_v25 = vrot.slane %v361_v14, 4  ;;  %v380_v54 = vrot.slane %v378_v40, 5  ;;  %v1479_v1 = vshrl.u32 %v4887_v42, 16  ;;  %v1498_v40 = vshll.u32 %v4899_v57, 16 }
  0x45   : > { %3999 = vmatprep.subr.bf16.mxu0 %v4362_v43  ;;  %3983 = vmatprep.mubr.bf16.mxu0 %v3418_v11  ;;  %v369_v28 = vshrl.u32 %v4869_v63, 16  ;;  %v372_v30 = vshll.u32 %v4869_v63, 16  ;;  %v1467_v9 = vsel %vm4731_vm2, %v1462_v52, %v1466_v18  ;;  %v1477_v11 = vsel %vm4731_vm2, %v1472_v53, %v1476_v38  ;;  %v4368_v18 = vld [vmem:[%s5735_s1 + $0x168] sm:$0xff]   ;;  %v4370_v53 = vld [vmem:[%s5735_s1 + $0x170] sm:$0xff]  }
  0x46   : > { %3874 = vmatpush3.bf16.msra.mxu1 %v4363_v3  ;;  %v367_v45 = vsel %vm4731_vm2, %v362_v25, %v366_v4  ;;  %v4893_v3 = vld [vmem:[%s4685_s28 + $0x40] sm:$0xf]  ;;  %v4904_v4 = vld [vmem:[%s4685_s28 + $0x3c] sm:$0xf]  ;;  %v3419_v15 = vcombine.low %v1467_v9, %v1477_v11  ;;  %v385_v17 = vor.u32 %v384_v59, %v380_v54  ;;  %v390_v19 = vrot.slane %v388_v60, 5 }
  0x47   : > { %3875 = vmatprep.subr.bf16.mxu1 %v4365_v10  ;;  %v371_v46 = vrot.slane %v369_v28, 4  ;;  %v374_v47 = vrot.slane %v372_v30, 5  ;;  %v3273_v51 = vcombine.low %v357_v22, %v367_v45  ;;  %v1488_v14 = vshll.u32 %v4893_v3, 16  ;;  %v4923_v30 = vld [vmem:[%s4685_s28 + $0x44] sm:$0x1]  ;;  %v4371_v60 = vld [vmem:[%s5735_s1 + $0x38] sm:$0xff]  }
  0x48   : > { %4000 = vmatpush3.bf16.msra.mxu0 %v4362_v43  ;;  %v4367_v43 = vld [vmem:[%s5735_s1 + $0x28] sm:$0xff]   ;;  %v1481_v22 = vrot.slane %v1479_v1, 4  ;;  %v1492_v28 = vshrl.u32 %v4893_v3, 16  ;;  %5753 = vst [vmem:[#allocation6_spill] sm:$0xff] %v4923_v30  ;;  %v386_v38 = vrot.slane %v385_v17, 4  ;;  %v393_v45 = vshrl.u32 %v4904_v4, 16 }
  0x49   : > { %4001 = vmatprep.subr.bf16.mxu0 %v4364_v0  ;;  %v375_v58 = vor.u32 %v374_v47, %v371_v46  ;;  %3856 = vmatmul.mubr.bf16.gmra.mrb[4].mxu1 %v3273_v51  ;;  %v1490_v25 = vrot.slane %v1488_v14, 5  ;;  %v396_v48 = vshll.u32 %v4904_v4, 16  ;;  %v402_v51 = vshll.u32 %v4916_v21, 16  ;;  %v4935_v52 = vld [vmem:[%s4685_s28 + $0x4c] sm:$0xf] }
  0x4a   : > { %3876 = vmatpush3.bf16.msra.mxu1 %v4365_v10  ;;  %3984 = vmatmul.mubr.bf16.gmra.mrb[4].mxu0 %v3419_v15  ;;  %v1494_v47 = vrot.slane %v1492_v28, 4  ;;  %v395_v59 = vrot.slane %v393_v45, 4  ;;  %v412_v15 = vshll.u32 %v4923_v30, 16  ;;  %v1506_v28 = vshll.u32 %v4926_v33, 16 }
  0x4b   : > { %v376_v10 = vrot.slane %v375_v58, 4  ;;  %3877 = vmatprep.subr.bf16.mxu1 %v4367_v43  ;;  %v1500_v58 = vrot.slane %v1498_v40, 5  ;;  %v398_v11 = vrot.slane %v396_v48, 5  ;;  %v1512_v45 = vshll.u32 %v4935_v52, 16 }
  0x4c   : > { %4002 = vmatpush3.bf16.msra.mxu0 %v4364_v0  ;;  %v1484_v0 = vrot.slane %v1482_v2, 5  ;;  %v1495_v9 = vor.u32 %v1494_v47, %v1490_v25  ;;  %v404_v2 = vrot.slane %v402_v51, 5  ;;  %v414_v40 = vrot.slane %v412_v15, 5  ;;  %v4976_v15 = vld [vmem:[%s4685_s28 + $0x50] sm:$0x1] }
  0x4d   : > { %4003 = vmatprep.subr.bf16.mxu0 %v4366_v32  ;;  %v381_v35 = vsel %vm4731_vm2, %v376_v10, %v380_v54  ;;  %v391_v54 = vsel %vm4731_vm2, %v386_v38, %v390_v19  ;;  %v1503_v10 = vshrl.u32 %v4926_v33, 16  ;;  %v1508_v48 = vrot.slane %v1506_v28, 5  ;;  %5755 = vst [vmem:[#allocation8_spill] sm:$0xff] %v4976_v15 }
  0x4e   : > { %3878 = vmatpush3.bf16.msra.mxu1 %v4367_v43  ;;  %v1485_v46 = vor.u32 %v1484_v0, %v1481_v22  ;;  %v406_v43 = vshrl.u32 %v4916_v21, 16  ;;  %v3274_v1 = vcombine.low %v381_v35, %v391_v54  ;;  %v1496_v19 = vrot.slane %v1495_v9, 4  ;;  %v4951_v0 = vld [vmem:[%s4685_s28 + $0x50] sm:$0x1]  ;;  %v4957_v35 = vld [vmem:[%s5735_s1 + $0x80] sm:$0xff]  }
  0x4f   : > { %3879 = vmatprep.subr.bf16.mxu1 %v4369_v5  ;;  %v399_v22 = vor.u32 %v398_v11, %v395_v59  ;;  %v1516_v51 = vshrl.u32 %v4935_v52, 16  ;;  %v4970_v54 = vld [vmem:[%s4685_s28 + $0x4c] sm:$0xf] }
  0x50   : > { %4004 = vmatpush3.bf16.msra.mxu0 %v4366_v32  ;;  %v1486_v32 = vrot.slane %v1485_v46, 4  ;;  %v408_v14 = vrot.slane %v406_v43, 4  ;;  %3859 = vmatprep.mubr.bf16.mxu1 %v3274_v1  ;;  %v4961_v46 = vld [vmem:[%s4685_s28 + $0x48] sm:$0xf]  ;;  %v1514_v1 = vrot.slane %v1512_v45, 5 }
  0x51   : > { %4005 = vmatprep.subr.bf16.mxu0 %v4368_v18  ;;  %5754 = vst [vmem:[#allocation7_spill] sm:$0xff] %v4961_v46  ;;  %v400_v47 = vrot.slane %v399_v22, 4  ;;  %v4990_v22 = vld [vmem:[%s5735_s1 + $0x180] sm:$0xff]   ;;  %v4993_v45 = vld [vmem:[%s4685_s28 + $0x58] sm:$0xf] }
  0x52   : > { %3880 = vmatpush3.bf16.msra.mxu1 %v4369_v5  ;;  %v1491_v17 = vsel %vm4731_vm2, %v1486_v32, %v1490_v25  ;;  %v409_v38 = vor.u32 %v408_v14, %v404_v2  ;;  %v1505_v5 = vrot.slane %v1503_v10, 4  ;;  %v4372_v25 = vld [vmem:[%s5735_s1 + $0x178] sm:$0xff]   ;;  %v1522_v32 = vshll.u32 %v4951_v0, 16 }
  0x53   : > { %3881 = vmatprep.subr.bf16.mxu1 %v4371_v60  ;;  %v405_v9 = vsel %vm4731_vm2, %v400_v47, %v404_v2  ;;  %v1518_v14 = vrot.slane %v1516_v51, 4  ;;  %v4985_v2 = vld [vmem:[%s4685_s28 + $0x54] sm:$0xf]  ;;  %v430_v47 = vshrl.u32 %v4970_v54, 16 }
  0x54   : > { %4006 = vmatpush3.bf16.msra.mxu0 %v4368_v18  ;;  %v1501_v18 = vsel %vm4731_vm2, %v1496_v19, %v1500_v58  ;;  %v410_v43 = vrot.slane %v409_v38, 4  ;;  %v1509_v11 = vor.u32 %v1508_v48, %v1505_v5  ;;  %v417_v58 = vshrl.u32 %v4961_v46, 16 }
  0x55   : > { %4007 = vmatprep.subr.bf16.mxu0 %v4370_v53  ;;  %v3420_v59 = vcombine.low %v1491_v17, %v1501_v18  ;;  %v1524_v17 = vrot.slane %v1522_v32, 5  ;;  %v426_v19 = vshll.u32 %v4970_v54, 16  ;;  %v1519_v38 = vor.u32 %v1518_v14, %v1514_v1 }
  0x56   : > { %3882 = vmatpush3.bf16.msra.mxu1 %v4371_v60  ;;  %v415_v10 = vsel %vm4731_vm2, %v410_v43, %v414_v40  ;;  %v420_v60 = vshll.u32 %v4961_v46, 16  ;;  %v1510_v28 = vrot.slane %v1509_v11, 4  ;;  %v419_v5 = vrot.slane %v417_v58, 4  ;;  %v5000_v43 = vld [vmem:[%s4685_s28 + $0x5c] sm:$0x1] }
  0x57   : > { %3899 = vmatprep.subr.bf16.mxu1 %v4957_v35  ;;  %3987 = vmatprep.mubr.bf16.mxu0 %v3420_v59  ;;  %v428_v18 = vrot.slane %v426_v19, 5  ;;  %v436_v48 = vshll.u32 %v4976_v15, 16  ;;  %v1520_v59 = vrot.slane %v1519_v38, 4  ;;  %v1527_v32 = vshrl.u32 %v4985_v2, 16  ;;  %v5034_v46 = vld [vmem:[%s4685_s28 + $0x68] sm:$0x1] }
  0x58   : > { %4008 = vmatpush3.bf16.msra.mxu0 %v4370_v53  ;;  %v3275_v53 = vcombine.low %v405_v9, %v415_v10  ;;  %v422_v40 = vrot.slane %v420_v60, 5  ;;  %v1515_v51 = vsel %vm4731_vm2, %v1510_v28, %v1514_v1  ;;  %v1530_v9 = vshll.u32 %v4985_v2, 16  ;;  %v5006_v60 = vld [vmem:[%s4685_s28 + $0x54] sm:$0xf]  ;;  %v5013_v28 = vld [vmem:[%s4685_s28 + $0x58] sm:$0xf] }
  0x59   : > { %4009 = vmatprep.subr.bf16.mxu0 %v4372_v25  ;;  %v432_v14 = vrot.slane %v430_v47, 4  ;;  %v438_v58 = vrot.slane %v436_v48, 5  ;;  %v1536_v10 = vshll.u32 %v4993_v45, 16  ;;  %5756 = vst [vmem:[#allocation9_spill] sm:$0xff] %v5006_v60  ;;  %v1525_v1 = vsel %vm4731_vm2, %v1520_v59, %v1524_v17  ;;  %v5016_v48 = vld [vmem:[%s4685_s28 + $0x5c] sm:$0x1] }
  0x5a   : > { %3860 = vmatmul.mubr.bf16.gmra.mrb[8].mxu1 %v3275_v53  ;;  %v423_v11 = vor.u32 %v422_v40, %v419_v5  ;;  %v1529_v19 = vrot.slane %v1527_v32, 4  ;;  %v1532_v53 = vrot.slane %v1530_v9, 5  ;;  %v3421_v38 = vcombine.low %v1515_v51, %v1525_v1  ;;  %v5021_v17 = vld [vmem:[%s4685_s28 + $0x60] sm:$0xf] }
  0x5b   : > { %v433_v40 = vor.u32 %v432_v14, %v428_v18  ;;  %v1538_v47 = vrot.slane %v1536_v10, 5  ;;  %v1546_v15 = vshll.u32 %v5000_v43, 16  ;;  %v441_v30 = vshrl.u32 %v5006_v60, 16 }
  0x5c   : > { %4010 = vmatpush3.bf16.msra.mxu0 %v4372_v25  ;;  %v1540_v25 = vshrl.u32 %v4993_v45, 16  ;;  %v424_v5 = vrot.slane %v423_v11, 4  ;;  %v1533_v8 = vor.u32 %v1532_v53, %v1529_v19  ;;  %v444_v51 = vshll.u32 %v5006_v60, 16  ;;  %v5028_v11 = vld [vmem:[%s4685_s28 + $0x64] sm:$0xf] }
  0x5d   : > { %4027 = vmatprep.subr.bf16.mxu0 %v4990_v22  ;;  %3988 = vmatmul.mubr.bf16.gmra.mrb[8].mxu0 %v3421_v38  ;;  %v434_v32 = vrot.slane %v433_v40, 4  ;;  %v450_v9 = vshll.u32 %v5013_v28, 16  ;;  %v1548_v1 = vrot.slane %v1546_v15, 5  ;;  %v443_v19 = vrot.slane %v441_v30, 4 }
  0x5e   : > { %v1542_v27 = vrot.slane %v1540_v25, 4  ;;  %v429_v59 = vsel %vm4731_vm2, %v424_v5, %v428_v18  ;;  %v1534_v14 = vrot.slane %v1533_v8, 4  ;;  %v446_v25 = vrot.slane %v444_v51, 5 }
  0x5f   : > { %v439_v53 = vsel %vm4731_vm2, %v434_v32, %v438_v58  ;;  %v452_v39 = vrot.slane %v450_v9, 5  ;;  %v454_v38 = vshrl.u32 %v5013_v28, 16  ;;  %v460_v60 = vshll.u32 %v5016_v48, 16 }
  0x60   : > { %v1543_v10 = vor.u32 %v1542_v27, %v1538_v47  ;;  %v3276_v18 = vcombine.low %v429_v59, %v439_v53  ;;  %v1539_v5 = vsel %vm4731_vm2, %v1534_v14, %v1538_v47  ;;  %v447_v8 = vor.u32 %v446_v25, %v443_v19 }
  0x61   : > { %v456_v27 = vrot.slane %v454_v38, 4  ;;  %v1551_v30 = vshrl.u32 %v5021_v17, 16  ;;  %v1554_v15 = vshll.u32 %v5021_v17, 16  ;;  %v462_v32 = vrot.slane %v460_v60, 5 }
  0x62   : > { %v1544_v40 = vrot.slane %v1543_v10, 4  ;;  %3863 = vmatprep.mubr.bf16.mxu1 %v3276_v18  ;;  %v1560_v51 = vshll.u32 %v5028_v11, 16  ;;  %v1564_v59 = vshrl.u32 %v5028_v11, 16  ;;  %v448_v47 = vrot.slane %v447_v8, 4 }
  0x63   : > { %v457_v14 = vor.u32 %v456_v27, %v452_v39  ;;  %v1553_v10 = vrot.slane %v1551_v30, 4  ;;  %v1556_v53 = vrot.slane %v1554_v15, 5  ;;  %v1570_v38 = vshll.u32 %v5034_v46, 16 }
  0x64   : > { %v1549_v58 = vsel %vm4731_vm2, %v1544_v40, %v1548_v1  ;;  %v1562_v19 = vrot.slane %v1560_v51, 5  ;;  %v1566_v25 = vrot.slane %v1564_v59, 4  ;;  %v453_v60 = vsel %vm4731_vm2, %v448_v47, %v452_v39 }
  0x65   : > { %v3422_v9 = vcombine.low %v1539_v5, %v1549_v58  ;;  %v458_v1 = vrot.slane %v457_v14, 4  ;;  %v3432_v5 = vrot.slane %v4705_v20, 9  ;;  %v1794_v40 = vrot.slane %v4708_v23, 5 }
  0x66   : > { %v1804_v8 = vrot.slane %v4766_v7, 5  ;;  %v1557_v27 = vor.u32 %v1556_v53, %v1553_v10  ;;  %v1567_v30 = vor.u32 %v1566_v25, %v1562_v19  ;;  %v1572_v15 = vrot.slane %v1570_v38, 5 }
  0x67   : > { %3991 = vmatprep.mubr.bf16.mxu0 %v3422_v9  ;;  %v463_v58 = vsel %vm4731_vm2, %v458_v1, %v462_v32  ;;  %v1795_v51 = vsel %vm5048_vm5, %v3432_v5, %v1794_v40  ;;  %v1796_v59 = vrot.slane %v1794_v40, 4  ;;  %v3433_v9 = vrot.slane %v4749_v56, 9 }
  0x68   : > { %v3277_v39 = vcombine.low %v453_v60, %v463_v58  ;;  %v1558_v47 = vrot.slane %v1557_v27, 4  ;;  %v1568_v14 = vrot.slane %v1567_v30, 4  ;;  %v1801_v20 = vrot.slane %v4755_v61, 5  ;;  %v4382_v58 = vld [vmem:[%s5735_s1 + $0x190] sm:$0xff]  }
  0x69   : > { %v5759_v23 = vrot.slane %v4711_v24, 5  ;;  %v3434_v10 = vrot.slane %v4796_v44, 9  ;;  %v1808_v32 = vrot.slane %v4802_v50, 5  ;;  %v5760_v61 = vcombine.low %v4694_v12, %v4697_v13 }
  0x6a   : > { %3864 = vmatmul.mubr.bf16.gmra.mrb[12].mxu1 %v3277_v39  ;;  %v1563_v53 = vsel %vm4731_vm2, %v1558_v47, %v1562_v19  ;;  %v1573_v56 = vsel %vm4731_vm2, %v1568_v14, %v1572_v15  ;;  %v1803_v24 = vrot.slane %v1801_v20, 4  ;;  %v1811_v1 = vrot.slane %v4806_v55, 5 }
  0x6b   : > { %v1798_v7 = vsel %vm5048_vm5, %v1796_v59, %v5759_v23  ;;  %v3423_v38 = vcombine.low %v1563_v53, %v1573_v56  ;;  %3883 = vmatprep.mubr.bf16.mxu1 %v5760_v61  ;;  %v1810_v60 = vrot.slane %v1808_v32, 4  ;;  %v3287_v44 = vcombine.low %v4724_v34, %v4737_v41  ;;  %v4377_v34 = vld [vmem:[%s5735_s1 + $0x88] sm:$0xff]   ;;  %v4384_v23 = vld [vmem:[%s5735_s1 + $0x198] sm:$0xff]   ;;  %v4387_v53 = vld [vmem:[%s5735_s1 + $0xa0] sm:$0xff]  }
  0x6c   : > { %v3456_v25 = vcombine.low %v1795_v51, %v1798_v7  ;;  %v1802_v50 = vsel %vm5048_vm5, %v3433_v9, %v1801_v20  ;;  %v1805_v19 = vsel %vm5048_vm5, %v1803_v24, %v1804_v8  ;;  %v1815_v5 = vrot.slane %v4839_v37, 5  ;;  %v4383_v51 = vld [vmem:[%s5735_s1 + $0x98] sm:$0xff]  }
  0x6d   : > { %3992 = vmatmul.mubr.bf16.gmra.mrb[12].mxu0 %v3423_v38  ;;  %v3288_v12 = vcombine.low %v4779_v26, %v4786_v31  ;;  %v1809_v13 = vsel %vm5048_vm5, %v3434_v10, %v1808_v32  ;;  %v1812_v55 = vsel %vm5048_vm5, %v1810_v60, %v1811_v1  ;;  %v1822_v40 = vrot.slane %v4893_v3, 5  ;;  %v4378_v31 = vld [vmem:[%s5735_s1 + $0x188] sm:$0xff]  }
  0x6e   : > { %4011 = vmatprep.mubr.bf16.mxu0 %v3456_v25  ;;  %v3457_v41 = vcombine.low %v1802_v50, %v1805_v19  ;;  %v3458_v8 = vcombine.low %v1809_v13, %v1812_v55  ;;  %v3435_v37 = vrot.slane %v4832_v29, 9  ;;  %v1817_v27 = vrot.slane %v1815_v5, 4  ;;  %v4381_v29 = vld [vmem:[%s5735_s1 + $0x90] sm:$0xff]   ;;  %v4438_v38 = vld [vmem:[%s4685_s28 + $0x8] sm:$0x1] }
  0x6f   : > { %v1818_v26 = vrot.slane %v4849_v49, 5  ;;  %v3436_v3 = vrot.slane %v4887_v42, 9  ;;  %v1824_v30 = vrot.slane %v1822_v40, 4  ;;  %v1825_v15 = vrot.slane %v4899_v57, 5  ;;  %v4389_v50 = vld [vmem:[%s5735_s1 + $0xa8] sm:$0xff]  }
  0x70   : > { %v3289_v49 = vcombine.low %v4813_v62, %v4820_v6  ;;  %v1829_v57 = vrot.slane %v4935_v52, 5  ;;  %v1836_v6 = vrot.slane %v4993_v45, 5  ;;  %v3290_v59 = vcombine.low %v4869_v63, %v4872_v16  ;;  %v4439_v13 = vld [vmem:[%s4685_s28] sm:$0xf] }
  0x71   : > { %v1819_v42 = vsel %vm5048_vm5, %v1817_v27, %v1818_v26  ;;  %v1826_v62 = vsel %vm5048_vm5, %v1824_v30, %v1825_v15  ;;  %v3437_v47 = vrot.slane %v4926_v33, 9  ;;  %v1832_v20 = vrot.slane %v4951_v0, 5  ;;  %v4437_v0 = vld [vmem:[%s4685_s28 + $0x4] sm:$0xf]  ;;  %v5762_v15 = vld [vmem:[#allocation5_spill] sm:$0xff] }
  0x72   : > { %3884 = vmatmul.mubr.bf16.vlgmr.msra.gmra.mrb[0].mxu1 %v3287_v44  ;;  %v1831_v14 = vrot.slane %v1829_v57, 4  ;;  %v3438_v7 = vrot.slane %v4985_v2, 9  ;;  %v1838_v10 = vrot.slane %v1836_v6, 4  ;;  %v1839_v32 = vrot.slane %v5000_v43, 5  ;;  %v4388_v44 = vld [vmem:[%s5735_s1 + $0x1a0] sm:$0xff]  }
  0x73   : > { %3900 = vmatpush3.bf16.msra.mxu1 %v4957_v35  ;;  %3887 = vmatprep.mubr.bf16.mxu1 %v3288_v12  ;;  %v1816_v35 = vsel %vm5048_vm5, %v3435_v37, %v1815_v5  ;;  %v1843_v56 = vrot.slane %v5028_v11, 5  ;;  %v864_v25 = vrot.slane %v4437_v0, 5  ;;  %v867_v61 = vrot.slane %v4438_v38, 5 }
  0x74   : > { %3901 = vmatprep.subr.bf16.mxu1 %v4377_v34  ;;  %v3459_v9 = vcombine.low %v1816_v35, %v1819_v42  ;;  %v3291_v24 = vcombine.low %v4904_v4, %v4916_v21  ;;  %v1830_v43 = vsel %vm5048_vm5, %v3437_v47, %v1829_v57  ;;  %v1833_v60 = vsel %vm5048_vm5, %v1831_v14, %v1832_v20  ;;  %v4441_v35 = vld [vmem:[%s4685_s28 + $0x10] sm:$0xf]  ;;  %v5199_v47 = vld [vmem:[%s4685_s28 + $0x1c] sm:$0xf] }
  0x75   : > { %4012 = vmatmul.mubr.bf16.vlgmr.msra.gmra.mrb[0].mxu0 %v3457_v41  ;;  %v3439_v1 = vrot.slane %v5021_v17, 9  ;;  %v1837_v19 = vsel %vm5048_vm5, %v3438_v7, %v1836_v6  ;;  %v1840_v5 = vsel %vm5048_vm5, %v1838_v10, %v1839_v32  ;;  %v1846_v12 = vrot.slane %v5034_v46, 5  ;;  %v4390_v46 = vld [vmem:[%s5735_s1 + $0x1a8] sm:$0xff]   ;;  %v4442_v14 = vld [vmem:[%s4685_s28 + $0x1c] sm:$0xf] }
  0x76   : > { %4028 = vmatpush3.bf16.msra.mxu0 %v4990_v22  ;;  %4015 = vmatprep.mubr.bf16.mxu0 %v3458_v8  ;;  %v1823_v22 = vsel %vm5048_vm5, %v3436_v3, %v1822_v40  ;;  %v3302_v55 = vrot.slane %v4439_v13, 9  ;;  %v5761_v40 = vld [vmem:[#allocation7_spill] sm:$0xff]  ;;  %v1845_v41 = vrot.slane %v1843_v56, 4  ;;  %v866_v8 = vrot.slane %v864_v25, 4  ;;  %v4395_v10 = vld [vmem:[%s5735_s1 + $0xb8] sm:$0xff]  }
  0x77   : > { %4029 = vmatprep.subr.bf16.mxu0 %v4378_v31  ;;  %3902 = vmatpush3.bf16.msra.mxu1 %v4377_v34  ;;  %v3460_v39 = vcombine.low %v1823_v22, %v1826_v62  ;;  %v3292_v34 = vcombine.low %v5761_v40, %v4970_v54  ;;  %v3461_v37 = vcombine.low %v1830_v43, %v1833_v60  ;;  %v3306_v27 = vrot.slane %v4869_v63, 9  ;;  %v5763_v63 = vld [vmem:[#allocation9_spill] sm:$0xff]  ;;  %v4443_v32 = vld [vmem:[%s4685_s28 + $0xc] sm:$0xf]  ;;  %v4445_v43 = vld [vmem:[%s4685_s28 + $0x20] sm:$0x1] }
  0x78   : > { %3903 = vmatprep.subr.bf16.mxu1 %v4381_v29  ;;  %v892_v26 = vrot.slane %v4872_v16, 5  ;;  %v3462_v30 = vcombine.low %v1837_v19, %v1840_v5  ;;  %v3293_v16 = vcombine.low %v5763_v63, %v5013_v28  ;;  %v871_v42 = vrot.slane %v4441_v35, 5 }
  0x79   : > { %v1844_v22 = vsel %vm5048_vm5, %v3439_v1, %v1843_v56  ;;  %v1847_v62 = vsel %vm5048_vm5, %v1845_v41, %v1846_v12  ;;  %v865_v6 = vsel %vm5048_vm5, %v3302_v55, %v864_v25  ;;  %v878_v20 = vrot.slane %v4442_v14, 5  ;;  %v5765_v55 = vld [vmem:[#allocation8_spill] sm:$0xff] }
  0x7a   : > { %4030 = vmatpush3.bf16.msra.mxu0 %v4378_v31  ;;  %3888 = vmatmul.mubr.bf16.gmra.mrb[4].mxu1 %v3289_v49  ;;  %v5163_v31 = vld [vmem:[%s4685_s28 + $0x14] sm:$0x1]  ;;  %v3307_v49 = vrot.slane %v4904_v4, 9  ;;  %v5176_v57 = vsel %vm5048_vm5, %v3306_v27, %v892_v26  ;;  %v873_v38 = vrot.slane %v871_v42, 4  ;;  %v881_v60 = vrot.slane %v4445_v43, 5 }
  0x7b   : > { %4031 = vmatprep.subr.bf16.mxu0 %v4382_v58  ;;  %3904 = vmatpush3.bf16.msra.mxu1 %v4381_v29  ;;  %v874_v3 = vrot.slane %v5163_v31, 5  ;;  %v895_v29 = vrot.slane %v5762_v15, 5  ;;  %v4393_v4 = vld [vmem:[%s5735_s1 + $0xb0] sm:$0xff]   ;;  %v3308_v1 = vrot.slane %v5761_v40, 9  ;;  %v880_v12 = vrot.slane %v878_v20, 4  ;;  %v4396_v40 = vld [vmem:[%s5735_s1 + $0x1b8] sm:$0xff]  }
  0x7c   : > { %3905 = vmatprep.subr.bf16.mxu1 %v4383_v51  ;;  %3891 = vmatprep.mubr.bf16.mxu1 %v3290_v59  ;;  %v5191_v59 = vld [vmem:[%s5735_s1 + $0x1b0] sm:$0xff]   ;;  %v913_v27 = vrot.slane %v5013_v28, 5  ;;  %v5251_v28 = vld [vmem:[%s4685_s28 + $0x24] sm:$0xf] }
  0x7d   : > { %4016 = vmatmul.mubr.bf16.gmra.mrb[4].mxu0 %v3459_v9  ;;  %v868_v9 = vsel %vm5048_vm5, %v866_v8, %v867_v61  ;;  %v4444_v61 = vld [vmem:[%s4685_s28 + $0x18] sm:$0xf] }
  0x7e   : > { %4032 = vmatpush3.bf16.msra.mxu0 %v4382_v58  ;;  %4019 = vmatprep.mubr.bf16.mxu0 %v3460_v39  ;;  %v894_v58 = vrot.slane %v892_v26, 4  ;;  %v5196_v39 = vld [vmem:[%s4685_s28 + $0x18] sm:$0xf]  ;;  %v3326_v19 = vcombine.low %v865_v6, %v868_v9  ;;  %v875_v26 = vsel %vm5048_vm5, %v873_v38, %v874_v3  ;;  %v915_v3 = vrot.slane %v913_v27, 4 }
  0x7f   : > { %4033 = vmatprep.subr.bf16.mxu0 %v4384_v23  ;;  %3906 = vmatpush3.bf16.msra.mxu1 %v4383_v51  ;;  %v899_v51 = vrot.slane %v4916_v21, 5  ;;  %v3514_v41 = vcombine.low %v5196_v39, %v5199_v47 }
  0x80   : > { %3907 = vmatprep.subr.bf16.mxu1 %v4387_v53  ;;  %v5204_v21 = vsel %vm5048_vm5, %v894_v58, %v895_v29  ;;  %v5268_v58 = vld [vmem:[%s4685_s28 + $0x30] sm:$0xf] }
  0x81   : > { %v3330_v56 = vcombine.low %v5176_v57, %v5204_v21  ;;  %v5215_v0 = vsel %vm5048_vm5, %v3307_v49, %v899_v51  ;;  %v901_v25 = vrot.slane %v899_v51, 4  ;;  %v5254_v49 = vld [vmem:[%s4685_s28 + $0x28] sm:$0xf]  ;;  %v4448_v51 = vld [vmem:[%s4685_s28 + $0x2c] sm:$0x1] }
  0x82   : > { %4034 = vmatpush3.bf16.msra.mxu0 %v4384_v23  ;;  %3892 = vmatmul.mubr.bf16.gmra.mrb[8].mxu1 %v3291_v24  ;;  %v5764_v23 = vld [vmem:[#allocation6_spill] sm:$0xff]  ;;  %v3304_v24 = vrot.slane %v4444_v61, 9  ;;  %v888_v9 = vrot.slane %v4448_v51, 5  ;;  %v3515_v38 = vcombine.low %v5251_v28, %v5254_v49  ;;  %v2364_v51 = vshll.u32 %v5268_v58, 16  ;;  %v4413_v57 = vld [vmem:[%s5735_s1 + $0xe8] sm:$0xff]  }
  0x83   : > { %4035 = vmatprep.subr.bf16.mxu0 %v4388_v44  ;;  %3908 = vmatpush3.bf16.msra.mxu1 %v4387_v53  ;;  %v902_v7 = vrot.slane %v5764_v23, 5  ;;  %v3303_v53 = vrot.slane %v4443_v32, 9  ;;  %v4400_v23 = vld [vmem:[%s5735_s1 + $0x1c0] sm:$0xff]  }
  0x84   : > { %3909 = vmatprep.subr.bf16.mxu1 %v4389_v50  ;;  %3895 = vmatprep.mubr.bf16.mxu1 %v3292_v34  ;;  %v909_v34 = vrot.slane %v5765_v55, 5  ;;  %v879_v35 = vsel %vm5048_vm5, %v3304_v24, %v878_v20  ;;  %v4402_v24 = vld [vmem:[%s5735_s1 + $0x1c8] sm:$0xff]   ;;  %v4406_v55 = vld [vmem:[%s5735_s1 + $0x1d0] sm:$0xff]  }
  0x85   : > { %4020 = vmatmul.mubr.bf16.gmra.mrb[8].mxu0 %v3461_v37  ;;  %v5222_v5 = vsel %vm5048_vm5, %v901_v25, %v902_v7  ;;  %v872_v8 = vsel %vm5048_vm5, %v3303_v53, %v871_v42  ;;  %v3309_v37 = vrot.slane %v5763_v63, 9  ;;  %v916_v63 = vrot.slane %v5016_v48, 5  ;;  %v4401_v25 = vld [vmem:[%s5735_s1 + $0xc8] sm:$0xff]  }
  0x86   : > { %4036 = vmatpush3.bf16.msra.mxu0 %v4388_v44  ;;  %4023 = vmatprep.mubr.bf16.mxu0 %v3462_v30  ;;  %v3463_v44 = vcombine.low %v1844_v22, %v1847_v62  ;;  %v3331_v13 = vcombine.low %v5215_v0, %v5222_v5  ;;  %v882_v42 = vsel %vm5048_vm5, %v880_v12, %v881_v60  ;;  %v4447_v22 = vld [vmem:[%s4685_s28 + $0x24] sm:$0xf]  ;;  %v5315_v12 = vld [vmem:[%s4685_s28 + $0x3c] sm:$0xf]  ;;  %v4416_v0 = vld [vmem:[%s5735_s1 + $0xf0] sm:$0xff]  }
  0x87   : > { %4037 = vmatprep.subr.bf16.mxu0 %v4390_v46  ;;  %3910 = vmatpush3.bf16.msra.mxu1 %v4389_v50  ;;  %v906_v50 = vrot.slane %v4970_v54, 5  ;;  %v4398_v54 = vld [vmem:[%s5735_s1 + $0xc0] sm:$0xff]   ;;  %v5258_v31 = vsel %vm5048_vm5, %v3309_v37, %v913_v27  ;;  %v3305_v62 = vrot.slane %v4447_v22, 9  ;;  %v3327_v48 = vcombine.low %v872_v8, %v875_v26  ;;  %5766 = vst [vmem:[#allocation7_spill] sm:$0xff] %v5315_v12  ;;  %v5326_v8 = vld [vmem:[%s4685_s28 + $0x48] sm:$0xf] }
  0x88   : > { %3911 = vmatprep.subr.bf16.mxu1 %v4393_v4  ;;  %v5284_v20 = vsel %vm5048_vm5, %v915_v3, %v916_v63  ;;  %v2337_v37 = vshrl.u32 %v5251_v28, 16  ;;  %v2340_v27 = vshll.u32 %v5251_v28, 16  ;;  %v2350_v26 = vshrl.u32 %v5254_v49, 16  ;;  %v4408_v3 = vld [vmem:[%s5735_s1 + $0x1d8] sm:$0xff]   ;;  %v4410_v22 = vld [vmem:[%s5735_s1 + $0xe0] sm:$0xff]  }
  0x89   : > { %v5248_v15 = vsel %vm5048_vm5, %v3308_v1, %v906_v50  ;;  %v908_v29 = vrot.slane %v906_v50, 4  ;;  %v4404_v1 = vld [vmem:[%s5735_s1 + $0xd0] sm:$0xff]   ;;  %v5318_v50 = vld [vmem:[%s4685_s28 + $0x40] sm:$0xf] }
  0x8a   : > { %4038 = vmatpush3.bf16.msra.mxu0 %v4390_v46  ;;  %3896 = vmatmul.mubr.bf16.gmra.mrb[12].mxu1 %v3293_v16  ;;  %v4446_v46 = vld [vmem:[%s4685_s28 + $0x28] sm:$0xf]  ;;  %v5440_v16 = vld [vmem:[%s4685_s28 + $0x44] sm:$0x1] }
  0x8b   : > { %4039 = vmatprep.subr.bf16.mxu0 %v5191_v59  ;;  %3912 = vmatpush3.bf16.msra.mxu1 %v4393_v4  ;;  %v885_v30 = vrot.slane %v4446_v46, 5  ;;  %v5271_v4 = vld [vmem:[%s4685_s28 + $0x34] sm:$0xf]  ;;  %v5276_v6 = vsel %vm5048_vm5, %v908_v29, %v909_v34  ;;  %v2326_v34 = vshrl.u32 %v5199_v47, 16  ;;  %v4407_v46 = vld [vmem:[%s5735_s1 + $0xd8] sm:$0xff]   ;;  %v3517_v29 = vcombine.low %v5315_v12, %v5318_v50  ;;  %5768 = vst [vmem:[#allocation9_spill] sm:$0xff] %v5440_v16 }
  0x8c   : > { %3913 = vmatprep.subr.bf16.mxu1 %v4395_v10  ;;  %3915 = vmatprep.mubr.bf16.mxu1 %v3326_v19  ;;  %v3332_v14 = vcombine.low %v5248_v15, %v5276_v6  ;;  %v3516_v61 = vcombine.low %v5268_v58, %v5271_v4  ;;  %v2316_v19 = vshll.u32 %v5196_v39, 16  ;;  %v2394_v15 = vshll.u32 %v5318_v50, 16 }
  0x8d   : > { %4024 = vmatmul.mubr.bf16.gmra.mrb[12].mxu0 %v3463_v44  ;;  %v887_v7 = vrot.slane %v885_v30, 4  ;;  %v886_v43 = vsel %vm5048_vm5, %v3305_v62, %v885_v30  ;;  %v2313_v44 = vshrl.u32 %v5196_v39, 16  ;;  %v2361_v30 = vshrl.u32 %v5268_v58, 16 }
  0x8e   : > { %4040 = vmatpush3.bf16.msra.mxu0 %v5191_v59  ;;  %4043 = vmatprep.mubr.bf16.mxu0 %v3514_v41  ;;  %v2322_v41 = vshll.u32 %v5199_v47, 16  ;;  %v5442_v59 = vrot.slane %v2394_v15, 5 }
  0x8f   : > { %4041 = vmatprep.subr.bf16.mxu0 %v4396_v40  ;;  %3914 = vmatpush3.bf16.msra.mxu1 %v4395_v10  ;;  %v3328_v10 = vcombine.low %v879_v35, %v882_v42  ;;  %v889_v60 = vsel %vm5048_vm5, %v887_v7, %v888_v9  ;;  %v2315_v63 = vrot.slane %v2313_v44, 4  ;;  %v2318_v35 = vrot.slane %v2316_v19, 5  ;;  %v5352_v9 = vld [vmem:[%s4685_s28 + $0x20] sm:$0x1]  ;;  %v5359_v7 = vld [vmem:[%s4685_s28 + $0x54] sm:$0xf] }
  0x90   : > { %3931 = vmatprep.subr.bf16.mxu1 %v4398_v54  ;;  %v5348_v62 = vrot.slane %v2322_v41, 5  ;;  %v2342_v44 = vrot.slane %v2340_v27, 5  ;;  %v2366_v41 = vrot.slane %v2364_v51, 5 }
  0x91   : > { %v2319_v21 = vor.u32 %v2318_v35, %v2315_v63  ;;  %v5389_v35 = vld [vmem:[%s4685_s28 + $0x38] sm:$0x1] }
  0x92   : > { %4042 = vmatpush3.bf16.msra.mxu0 %v4396_v40  ;;  %3916 = vmatmul.mubr.bf16.vlgmr.msra.gmra.mrb[0].mxu1 %v3327_v48  ;;  %v3329_v40 = vcombine.low %v886_v43, %v889_v60  ;;  %v2328_v48 = vrot.slane %v2326_v34, 4  ;;  %v2370_v43 = vshll.u32 %v5271_v4, 16  ;;  %v2332_v60 = vshll.u32 %v5352_v9, 16 }
  0x93   : > { %4059 = vmatprep.subr.bf16.mxu0 %v4400_v23  ;;  %3932 = vmatpush3.bf16.msra.mxu1 %v4398_v54  ;;  %v5329_v54 = vld [vmem:[%s4685_s28 + $0x4c] sm:$0xf]  ;;  %v2352_v34 = vrot.slane %v2350_v26, 4  ;;  %v2320_v27 = vrot.slane %v2319_v21, 4  ;;  %v4450_v21 = vld [vmem:[%s4685_s28 + $0x10] sm:$0xf] }
  0x94   : > { %3933 = vmatprep.subr.bf16.mxu1 %v4401_v25  ;;  %3919 = vmatprep.mubr.bf16.mxu1 %v3328_v10  ;;  %v3518_v42 = vcombine.low %v5326_v8, %v5329_v54  ;;  %v2374_v10 = vshrl.u32 %v5271_v4, 16  ;;  %v2422_v6 = vshrl.u32 %v5329_v54, 16 }
  0x95   : > { %4044 = vmatmul.mubr.bf16.vlgmr.msra.gmra.mrb[0].mxu0 %v3515_v38  ;;  %v4412_v38 = vld [vmem:[%s5735_s1 + $0x1e0] sm:$0xff]  }
  0x96   : > { %4060 = vmatpush3.bf16.msra.mxu0 %v4400_v23  ;;  %4047 = vmatprep.mubr.bf16.mxu0 %v3516_v61  ;;  %v2346_v23 = vshll.u32 %v5254_v49, 16  ;;  %v5369_v61 = vld [vmem:[%s4685_s28 + $0x60] sm:$0xf] }
  0x97   : > { %4061 = vmatprep.subr.bf16.mxu0 %v4402_v24  ;;  %3934 = vmatpush3.bf16.msra.mxu1 %v4401_v25  ;;  %v5362_v25 = vld [vmem:[%s4685_s28 + $0x58] sm:$0xf] }
  0x98   : > { %3935 = vmatprep.subr.bf16.mxu1 %v4404_v1  ;;  %v5380_v19 = vrot.slane %v2346_v23, 5  ;;  %v3519_v63 = vcombine.low %v5359_v7, %v5362_v25  ;;  %v2398_v23 = vshrl.u32 %v5318_v50, 16  ;;  %v2446_v15 = vshrl.u32 %v5362_v25, 16 }
  0x9a   : > { %4062 = vmatpush3.bf16.msra.mxu0 %v4402_v24  ;;  %3920 = vmatmul.mubr.bf16.gmra.mrb[4].mxu1 %v3329_v40  ;;  %v5372_v24 = vld [vmem:[%s4685_s28 + $0x64] sm:$0xf]  ;;  %v2363_v40 = vrot.slane %v2361_v30, 4  ;;  %v2334_v30 = vrot.slane %v2332_v60, 5 }
  0x9b   : > { %4063 = vmatprep.subr.bf16.mxu0 %v4406_v55  ;;  %3936 = vmatpush3.bf16.msra.mxu1 %v4404_v1  ;;  %v2339_v1 = vrot.slane %v2337_v37, 4  ;;  %v3520_v37 = vcombine.low %v5369_v61, %v5372_v24 }
  0x9c   : > { %3937 = vmatprep.subr.bf16.mxu1 %v4407_v46  ;;  %3923 = vmatprep.mubr.bf16.mxu1 %v3330_v56  ;;  %v2329_v56 = vor.u32 %v2328_v48, %v5348_v62  ;;  %v2388_v48 = vshll.u32 %v5315_v12, 16  ;;  %v2367_v60 = vor.u32 %v2366_v41, %v2363_v40  ;;  %v2418_v41 = vshll.u32 %v5329_v54, 16 }
  0x9d   : > { %4048 = vmatmul.mubr.bf16.gmra.mrb[4].mxu0 %v3517_v29  ;;  %v2385_v29 = vshrl.u32 %v5315_v12, 16  ;;  %v2343_v5 = vor.u32 %v2342_v44, %v2339_v1  ;;  %v2380_v1 = vshll.u32 %v5389_v35, 16  ;;  %v2409_v44 = vshrl.u32 %v5326_v8, 16 }
  0x9e   : > { %4064 = vmatpush3.bf16.msra.mxu0 %v4406_v55  ;;  %4051 = vmatprep.mubr.bf16.mxu0 %v3518_v42  ;;  %v5383_v55 = vld [vmem:[%s4685_s28 + $0x2c] sm:$0x1]  ;;  %v5391_v42 = vrot.slane %v2370_v43, 5  ;;  %v2330_v26 = vrot.slane %v2329_v56, 4 }
  0x9f   : > { %4065 = vmatprep.subr.bf16.mxu0 %v4408_v3  ;;  %3938 = vmatpush3.bf16.msra.mxu1 %v4407_v46  ;;  %v2376_v46 = vrot.slane %v2374_v10, 4  ;;  %v2356_v51 = vshll.u32 %v5383_v55, 16  ;;  %v5415_v10 = vld [vmem:[%s4685_s28 + $0x70] sm:$0xf]  ;;  %v4449_v43 = vld [vmem:[%s4685_s28 + $0xc] sm:$0xf] }
  0xa0   : > { %3939 = vmatprep.subr.bf16.mxu1 %v4410_v22  ;;  %v3384_v56 = vcombine.low %v4449_v43, %v4450_v21  ;;  %v2335_v40 = vsel %vm4731_vm2, %v2330_v26, %v2334_v30  ;;  %v2382_v26 = vrot.slane %v2380_v1, 5  ;;  %v2387_v30 = vrot.slane %v2385_v29, 4 }
  0xa1   : > { %v2377_v53 = vor.u32 %v2376_v46, %v5391_v42  ;;  %v2344_v46 = vrot.slane %v2343_v5, 4  ;;  %v2358_v43 = vrot.slane %v2356_v51, 5  ;;  %v2390_v21 = vrot.slane %v2388_v48, 5 }
  0xa2   : > { %4066 = vmatpush3.bf16.msra.mxu0 %v4408_v3  ;;  %3924 = vmatmul.mubr.bf16.gmra.mrb[8].mxu1 %v3331_v13  ;;  %v4414_v3 = vld [vmem:[%s5735_s1 + $0x1e8] sm:$0xff]   ;;  %v2353_v13 = vor.u32 %v2352_v34, %v5380_v19  ;;  %v2412_v34 = vshll.u32 %v5326_v8, 16  ;;  %v2400_v5 = vrot.slane %v2398_v23, 4  ;;  %v2411_v51 = vrot.slane %v2409_v44, 4  ;;  %v5458_v44 = vld [vmem:[%s4685_s28 + $0x50] sm:$0x1] }
  0xa3   : > { %4067 = vmatprep.subr.bf16.mxu0 %v4412_v38  ;;  %3940 = vmatpush3.bf16.msra.mxu1 %v4410_v22  ;;  %v5412_v22 = vld [vmem:[%s4685_s28 + $0x6c] sm:$0xf]  ;;  %v2378_v32 = vrot.slane %v2377_v53, 4  ;;  %v5447_v1 = vrot.slane %v2418_v41, 5  ;;  %v2424_v29 = vrot.slane %v2422_v6, 4  ;;  %v2433_v53 = vshrl.u32 %v5359_v7, 16 }
  0xa4   : > { %3941 = vmatprep.subr.bf16.mxu1 %v4413_v57  ;;  %3927 = vmatprep.mubr.bf16.mxu1 %v3332_v14  ;;  %5767 = vst [vmem:[#allocation5_spill] sm:$0xff] %v5412_v22  ;;  %v2325_v14 = vsel %vm4731_vm2, %v2320_v27, %v5348_v62  ;;  %v4419_v62 = vld [vmem:[%s5735_s1 + $0xf8] sm:$0xff]   ;;  %v2368_v27 = vrot.slane %v2367_v60, 4  ;;  %v2414_v60 = vrot.slane %v2412_v34, 5  ;;  %v2436_v48 = vshll.u32 %v5359_v7, 16  ;;  %v4423_v6 = vld [vmem:[%s5735_s1 + $0x200] sm:$0xff]  }
  0xa5   : > { %4052 = vmatmul.mubr.bf16.gmra.mrb[8].mxu0 %v3519_v63  ;;  %v3521_v63 = vcombine.low %v5412_v22, %v5415_v10  ;;  %v2349_v34 = vsel %vm4731_vm2, %v2344_v46, %v5380_v19  ;;  %v2391_v41 = vor.u32 %v2390_v21, %v2387_v30  ;;  %v2383_v19 = vsel %vm4731_vm2, %v2378_v32, %v2382_v26 }
  0xa6   : > { %4068 = vmatpush3.bf16.msra.mxu0 %v4412_v38  ;;  %4055 = vmatprep.mubr.bf16.mxu0 %v3520_v37  ;;  %v4418_v38 = vld [vmem:[%s5735_s1 + $0x1f0] sm:$0xff]   ;;  %v2354_v37 = vrot.slane %v2353_v13, 4  ;;  %v5769_v13 = vcombine.low %v5258_v31, %v5284_v20  ;;  %v4420_v31 = vld [vmem:[%s5735_s1 + $0x1f8] sm:$0xff]   ;;  %v2442_v46 = vshll.u32 %v5362_v25, 16  ;;  %v2415_v30 = vor.u32 %v2414_v60, %v2411_v51 }
  0xa7   : > { %4069 = vmatprep.subr.bf16.mxu0 %v4414_v3  ;;  %3942 = vmatpush3.bf16.msra.mxu1 %v4413_v57  ;;  %v3546_v57 = vcombine.low %v2325_v14, %v2335_v40  ;;  %v4451_v20 = vld [vmem:[%s4685_s28 + $0x18] sm:$0xf]  ;;  %v4454_v14 = vld [vmem:[%s4685_s28 + $0x28] sm:$0xf]  ;;  %v2425_v21 = vor.u32 %v2424_v29, %v5447_v1  ;;  %v2466_v32 = vshll.u32 %v5372_v24, 16  ;;  %v2435_v51 = vrot.slane %v2433_v53, 4 }
  0xa8   : > { %3943 = vmatprep.subr.bf16.mxu1 %v4416_v0  ;;  %v2438_v60 = vrot.slane %v2436_v48, 5  ;;  %v5487_v29 = vrot.slane %v2442_v46, 5  ;;  %v4427_v46 = vld [vmem:[%s5735_s1 + $0x210] sm:$0xff]  }
  0xa9   : > { %v5492_v53 = vrot.slane %v2466_v32, 5  ;;  %v2490_v32 = vshll.u32 %v5415_v10, 16 }
  0xaa   : > { %4070 = vmatpush3.bf16.msra.mxu0 %v4414_v3  ;;  %3928 = vmatmul.mubr.bf16.gmra.mrb[12].mxu1 %v5769_v13  ;;  %v4452_v3 = vld [vmem:[%s4685_s28 + $0x1c] sm:$0xf]  ;;  %v2404_v13 = vshll.u32 %v5440_v16, 16 }
  0xab   : > { %4071 = vmatprep.subr.bf16.mxu0 %v4418_v38  ;;  %3944 = vmatpush3.bf16.msra.mxu1 %v4416_v0  ;;  %v3385_v23 = vcombine.low %v4451_v20, %v4452_v3  ;;  %v4453_v0 = vld [vmem:[%s4685_s28 + $0x24] sm:$0xf]  ;;  %v2359_v20 = vsel %vm4731_vm2, %v2354_v37, %v2358_v43  ;;  %v2401_v3 = vor.u32 %v2400_v5, %v5442_v59  ;;  %v2457_v37 = vshrl.u32 %v5369_v61, 16  ;;  %v5490_v16 = vld [vmem:[%s4685_s28 + $0x5c] sm:$0x1] }
  0xac   : > { %3945 = vmatprep.subr.bf16.mxu1 %v4419_v62  ;;  %3947 = vmatprep.mubr.bf16.mxu1 %v3384_v56  ;;  %v3386_v40 = vcombine.low %v4453_v0, %v4454_v14  ;;  %v2373_v56 = vsel %vm4731_vm2, %v2368_v27, %v5391_v42  ;;  %v2460_v43 = vshll.u32 %v5369_v61, 16  ;;  %v2470_v42 = vshrl.u32 %v5372_v24, 16 }
  0xad   : > { %4056 = vmatmul.mubr.bf16.gmra.mrb[12].mxu0 %v3521_v63  ;;  %v2428_v63 = vshll.u32 %v5458_v44, 16  ;;  %v3547_v27 = vcombine.low %v2349_v34, %v2359_v20  ;;  %v3548_v26 = vcombine.low %v2373_v56, %v2383_v19  ;;  %v2406_v5 = vrot.slane %v2404_v13, 5  ;;  %v4456_v56 = vld [vmem:[%s4685_s28 + $0x34] sm:$0xf] }
  0xae   : > { %4072 = vmatpush3.bf16.msra.mxu0 %v4418_v38  ;;  %4075 = vmatprep.mubr.bf16.mxu0 %v3546_v57  ;;  %v4424_v38 = vld [vmem:[%s5735_s1 + $0x208] sm:$0xff]   ;;  %v2392_v57 = vrot.slane %v2391_v41, 4  ;;  %v2448_v0 = vrot.slane %v2446_v15, 4  ;;  %v2416_v34 = vrot.slane %v2415_v30, 4  ;;  %v2426_v14 = vrot.slane %v2425_v21, 4 }
  0xaf   : > { %4073 = vmatprep.subr.bf16.mxu0 %v4420_v31  ;;  %3946 = vmatpush3.bf16.msra.mxu1 %v4419_v62  ;;  %v2402_v62 = vrot.slane %v2401_v3, 4  ;;  %v2430_v20 = vrot.slane %v2428_v63, 5  ;;  %v2459_v41 = vrot.slane %v2457_v37, 4  ;;  %v2462_v13 = vrot.slane %v2460_v43, 5  ;;  %v5502_v3 = vld [vmem:[%s4685_s28 + $0x68] sm:$0x1] }
  0xb0   : > { %4123 = vmatprep.subr.bf16.mxu1 %v4423_v6  ;;  %v2472_v48 = vrot.slane %v2470_v42, 4  ;;  %v2481_v15 = vshrl.u32 %v5412_v22, 16  ;;  %v2494_v30 = vshrl.u32 %v5415_v10, 16  ;;  %v2439_v21 = vor.u32 %v2438_v60, %v2435_v51 }
  0xb1   : > { %v2449_v63 = vor.u32 %v2448_v0, %v5487_v29  ;;  %v2452_v37 = vshll.u32 %v5490_v16, 16  ;;  %v2407_v43 = vsel %vm4731_vm2, %v2402_v62, %v2406_v5  ;;  %v2421_v42 = vsel %vm4731_vm2, %v2416_v34, %v5447_v1  ;;  %v4457_v5 = vld [vmem:[%s4685_s28 + $0x3c] sm:$0xf]  ;;  %v4458_v1 = vld [vmem:[%s4685_s28 + $0x40] sm:$0xf] }
  0xb2   : > { %4074 = vmatpush3.bf16.msra.mxu0 %v4420_v31  ;;  %3948 = vmatmul.mubr.bf16.vlgmr.msra.gmra.mrb[0].mxu1 %v3385_v23  ;;  %v2484_v31 = vshll.u32 %v5412_v22, 16  ;;  %v4455_v23 = vld [vmem:[%s4685_s28 + $0x30] sm:$0xf]  ;;  %v3388_v51 = vcombine.low %v4457_v5, %v4458_v1  ;;  %v2483_v60 = vrot.slane %v2481_v15, 4  ;;  %v2440_v34 = vrot.slane %v2439_v21, 4  ;;  %v4431_v15 = vld [vmem:[%s5735_s1 + $0x220] sm:$0xff]  }
  0xb3   : > { %4091 = vmatprep.subr.bf16.mxu0 %v4423_v6  ;;  %4131 = vmatpush3.bf16.msra.mxu1 %v4423_v6  ;;  %v3387_v19 = vcombine.low %v4455_v23, %v4456_v56  ;;  %v2450_v23 = vrot.slane %v2449_v63, 4  ;;  %v2752_v21 = vrot.slane %v5329_v54, 5  ;;  %v4432_v54 = vld [vmem:[%s5735_s1 + $0x228] sm:$0xff]   ;;  %v3567_v5 = vrot.slane %v5359_v7, 9 }
  0xb4   : > { %4124 = vmatprep.subr.bf16.mxu1 %v4424_v38  ;;  %3951 = vmatprep.mubr.bf16.mxu1 %v3386_v40  ;;  %v2397_v40 = vsel %vm4731_vm2, %v2392_v57, %v5442_v59  ;;  %v2476_v59 = vshll.u32 %v5502_v3, 16  ;;  %v4428_v57 = vld [vmem:[%s5735_s1 + $0x218] sm:$0xff]   ;;  %v2486_v0 = vrot.slane %v2484_v31, 5  ;;  %v2738_v1 = vrot.slane %v5271_v4, 5 }
  0xb5   : > { %4076 = vmatmul.mubr.bf16.vlgmr.msra.gmra.mrb[0].mxu0 %v3547_v27  ;;  %v2431_v27 = vsel %vm4731_vm2, %v2426_v14, %v2430_v20  ;;  %v3549_v62 = vcombine.low %v2397_v40, %v2407_v43  ;;  %v2454_v14 = vrot.slane %v2452_v37, 5  ;;  %v2724_v37 = vrot.slane %v5199_v47, 5 }
  0xb6   : > { %4092 = vmatpush3.bf16.msra.mxu0 %v4423_v6  ;;  %4079 = vmatprep.mubr.bf16.mxu0 %v3548_v26  ;;  %v2463_v6 = vor.u32 %v2462_v13, %v2459_v41  ;;  %v2473_v26 = vor.u32 %v2472_v48, %v5492_v53  ;;  %v3550_v20 = vcombine.low %v2421_v42, %v2431_v27  ;;  %v5526_v41 = vld [vmem:[%s4685_s28 + $0x74] sm:$0x1]  ;;  %v5528_v13 = vrot.slane %v2490_v32, 5 }
  0xb7   : > { %4093 = vmatprep.subr.bf16.mxu0 %v4424_v38  ;;  %4132 = vmatpush3.bf16.msra.mxu1 %v4424_v38  ;;  %v2496_v48 = vrot.slane %v2494_v30, 4  ;;  %v2478_v22 = vrot.slane %v2476_v59, 5  ;;  %v2487_v31 = vor.u32 %v2486_v0, %v2483_v60  ;;  %v2500_v30 = vshll.u32 %v5526_v41, 16 }
  0xb8   : > { %4125 = vmatprep.subr.bf16.mxu1 %v4427_v46  ;;  %v2464_v56 = vrot.slane %v2463_v6, 4  ;;  %v2474_v12 = vrot.slane %v2473_v26, 4  ;;  %v2759_v43 = vrot.slane %v5362_v25, 5  ;;  %v3562_v47 = vrot.slane %v5196_v39, 9 }
  0xb9   : > { %v2497_v63 = vor.u32 %v2496_v48, %v5528_v13  ;;  %v2502_v32 = vrot.slane %v2500_v30, 5  ;;  %v3566_v27 = vrot.slane %v5326_v8, 9  ;;  %v2754_v6 = vrot.slane %v2752_v21, 4 }
  0xba   : > { %4094 = vmatpush3.bf16.msra.mxu0 %v4424_v38  ;;  %3952 = vmatmul.mubr.bf16.gmra.mrb[4].mxu1 %v3387_v19  ;;  %v2445_v38 = vsel %vm4731_vm2, %v2440_v34, %v5487_v29  ;;  %v2455_v19 = vsel %vm4731_vm2, %v2450_v23, %v2454_v14  ;;  %v2469_v40 = vsel %vm4731_vm2, %v2464_v56, %v5492_v53  ;;  %v2755_v53 = vrot.slane %v5458_v44, 5 }
  0xbb   : > { %4095 = vmatprep.subr.bf16.mxu0 %v4427_v46  ;;  %4133 = vmatpush3.bf16.msra.mxu1 %v4427_v46  ;;  %v2479_v29 = vsel %vm4731_vm2, %v2474_v12, %v2478_v22  ;;  %v3551_v42 = vcombine.low %v2445_v38, %v2455_v19  ;;  %v5770_v12 = vcombine.low %v4926_v33, %v4935_v52  ;;  %v2498_v22 = vrot.slane %v2497_v63, 4  ;;  %v4435_v33 = vld [vmem:[%s5735_s1 + $0x230] sm:$0xff]  }
  0xbc   : > { %4126 = vmatprep.subr.bf16.mxu1 %v4428_v57  ;;  %3955 = vmatprep.mubr.bf16.mxu1 %v3388_v51  ;;  %v3552_v25 = vcombine.low %v2469_v40, %v2479_v29  ;;  %v2726_v26 = vrot.slane %v2724_v37, 4  ;;  %v2727_v59 = vrot.slane %v5352_v9, 5  ;;  %v2761_v39 = vrot.slane %v2759_v43, 4  ;;  %v5773_v19 = vld [vmem:[#allocation5_spill] sm:$0xff]  ;;  %v5774_v29 = vld [vmem:[#allocation7_spill] sm:$0xff] }
  0xbd   : > { %4080 = vmatmul.mubr.bf16.gmra.mrb[4].mxu0 %v3549_v62  ;;  %v2762_v8 = vrot.slane %v5490_v16, 5  ;;  %v5771_v44 = vcombine.low %v4985_v2, %v4993_v45  ;;  %v2766_v52 = vrot.slane %v5372_v24, 5  ;;  %v2725_v7 = vsel %vm5048_vm5, %v3562_v47, %v2724_v37 }
  0xbe   : > { %4096 = vmatpush3.bf16.msra.mxu0 %v4427_v46  ;;  %4083 = vmatprep.mubr.bf16.mxu0 %v3550_v20  ;;  %v2488_v46 = vrot.slane %v2487_v31, 4  ;;  %v2753_v16 = vsel %vm5048_vm5, %v3566_v27, %v2752_v21  ;;  %v2756_v2 = vsel %vm5048_vm5, %v2754_v6, %v2755_v53  ;;  %v2503_v45 = vsel %vm4731_vm2, %v2498_v22, %v2502_v32 }
  0xbf   : > { %4097 = vmatprep.subr.bf16.mxu0 %v4428_v57  ;;  %4134 = vmatpush3.bf16.msra.mxu1 %v4428_v57  ;;  %v2728_v24 = vsel %vm5048_vm5, %v2726_v26, %v2727_v59  ;;  %v3563_v51 = vrot.slane %v5251_v28, 9  ;;  %v2760_v60 = vsel %vm5048_vm5, %v3567_v5, %v2759_v43  ;;  %v3590_v0 = vcombine.low %v2753_v16, %v2756_v2 }
  0xc0   : > { %4127 = vmatprep.subr.bf16.mxu1 %v4431_v15  ;;  %v2493_v9 = vsel %vm4731_vm2, %v2488_v46, %v5528_v13  ;;  %v3568_v62 = vrot.slane %v5369_v61, 9  ;;  %v2768_v34 = vrot.slane %v2766_v52, 4  ;;  %v3586_v4 = vcombine.low %v2725_v7, %v2728_v24 }
  0xc1   : > { %v3553_v23 = vcombine.low %v2493_v9, %v2503_v45  ;;  %v2734_v14 = vrot.slane %v5383_v55, 5  ;;  %v2763_v28 = vsel %vm5048_vm5, %v2761_v39, %v2762_v8  ;;  %v5772_v20 = vcombine.low %v5021_v17, %v5028_v11 }
  0xc2   : > { %4098 = vmatpush3.bf16.msra.mxu0 %v4428_v57  ;;  %3956 = vmatmul.mubr.bf16.gmra.mrb[8].mxu1 %v5770_v12  ;;  %v2731_v57 = vrot.slane %v5254_v49, 5  ;;  %v2769_v49 = vrot.slane %v5502_v3, 5  ;;  %v3564_v48 = vrot.slane %v5268_v58, 9  ;;  %v2740_v56 = vrot.slane %v2738_v1, 4 }
  0xc3   : > { %4099 = vmatprep.subr.bf16.mxu0 %v4431_v15  ;;  %4135 = vmatpush3.bf16.msra.mxu1 %v4431_v15  ;;  %v2741_v61 = vrot.slane %v5389_v35, 5  ;;  %v2773_v3 = vrot.slane %v5415_v10, 5  ;;  %v2767_v55 = vsel %vm5048_vm5, %v3568_v62, %v2766_v52  ;;  %v3591_v11 = vcombine.low %v2760_v60, %v2763_v28 }
  0xc4   : > { %4128 = vmatprep.subr.bf16.mxu1 %v4432_v54  ;;  %3959 = vmatprep.mubr.bf16.mxu1 %v5771_v44  ;;  %v2733_v13 = vrot.slane %v2731_v57, 4  ;;  %v2732_v17 = vsel %vm5048_vm5, %v3563_v51, %v2731_v57  ;;  %v2739_v35 = vsel %vm5048_vm5, %v3564_v48, %v2738_v1  ;;  %v2745_v31 = vrot.slane %v5318_v50, 5 }
  0xc5   : > { %4084 = vmatmul.mubr.bf16.gmra.mrb[8].mxu0 %v3551_v42  ;;  %v2742_v10 = vsel %vm5048_vm5, %v2740_v56, %v2741_v61  ;;  %v3569_v30 = vrot.slane %v5773_v19, 9  ;;  %v2775_v21 = vrot.slane %v2773_v3, 4  ;;  %v2776_v63 = vrot.slane %v5526_v41, 5 }
  0xc6   : > { %4100 = vmatpush3.bf16.msra.mxu0 %v4431_v15  ;;  %4087 = vmatprep.mubr.bf16.mxu0 %v3552_v25  ;;  %v2770_v15 = vsel %vm5048_vm5, %v2768_v34, %v2769_v49  ;;  %v2735_v58 = vsel %vm5048_vm5, %v2733_v13, %v2734_v14  ;;  %v3588_v40 = vcombine.low %v2739_v35, %v2742_v10  ;;  %v3565_v43 = vrot.slane %v5774_v29, 9 }
  0xc7   : > { %4101 = vmatprep.subr.bf16.mxu0 %v4432_v54  ;;  %4136 = vmatpush3.bf16.msra.mxu1 %v4432_v54  ;;  %v3592_v38 = vcombine.low %v2767_v55, %v2770_v15  ;;  %v3587_v37 = vcombine.low %v2732_v17, %v2735_v58  ;;  %v2747_v42 = vrot.slane %v2745_v31, 4  ;;  %v2774_v50 = vsel %vm5048_vm5, %v3569_v30, %v2773_v3 }
  0xc8   : > { %4129 = vmatprep.subr.bf16.mxu1 %v4435_v33  ;;  %v2777_v47 = vsel %vm5048_vm5, %v2775_v21, %v2776_v63  ;;  %v2746_v41 = vsel %vm5048_vm5, %v3565_v43, %v2745_v31 }
  0xc9   : > { %v3593_v27 = vcombine.low %v2774_v50, %v2777_v47 }
  0xca   : > { %4102 = vmatpush3.bf16.msra.mxu0 %v4432_v54  ;;  %3960 = vmatmul.mubr.bf16.gmra.mrb[12].mxu1 %v5772_v20  ;;  %v5775_v54 = vld [vmem:[#allocation9_spill] sm:$0xff]  ;;  %v5635_v20 = vld [vmem:[%s5736_s2] ss:$0 sm:$0xff] }
  0xcb   : > { %4103 = vmatprep.subr.bf16.mxu0 %v4435_v33  ;;  %4137 = vmatpush3.bf16.msra.mxu1 %v4435_v33  ;;  %v2748_v46 = vrot.slane %v5775_v54, 5 }
  0xcc   : > { %4130 = vmatprep.subr.bf16.mxu1 %v4436_v36  ;;  %4115 = vmatprep.mubr.bf16.mxu1 %v3590_v0 }
  0xcd   : > { %4088 = vmatmul.mubr.bf16.gmra.mrb[12].mxu0 %v3553_v23  ;;  %v2749_v32 = vsel %vm5048_vm5, %v2747_v42, %v2748_v46 }
  0xce   : > { %4104 = vmatpush3.bf16.msra.mxu0 %v4435_v33  ;;  %4107 = vmatprep.mubr.bf16.mxu0 %v3586_v4  ;;  %v3589_v6 = vcombine.low %v2746_v41, %v2749_v32 }
  0xcf   : > { %4105 = vmatprep.subr.bf16.mxu0 %v4436_v36  ;;  %4138 = vmatpush3.bf16.msra.mxu1 %v4436_v36 }
  0xd2   : > { %4106 = vmatpush3.bf16.msra.mxu0 %v4436_v36  ;;  %4116 = vmatmul.mubr.bf16.vlgmr.msra.gmra.mrb[16].mxu1 %v3591_v11 }
  0xd3   : > { %4119 = vmatprep.mubr.bf16.mxu1 %v3592_v38 }
  0xd5   : > { %4108 = vmatmul.mubr.bf16.vlgmr.msra.gmra.mrb[0].mxu0 %v3587_v37 }
  0xd6   : > { %4111 = vmatprep.mubr.bf16.mxu0 %v3588_v40 }
  0xda   : > { %4120 = vmatmul.mubr.bf16.gmra.mrb[20].mxu1 %v3593_v27 }
  0xdd   : > { %4112 = vmatmul.mubr.bf16.gmra.mrb[4].mxu0 %v3589_v6 }
 0x185   : > { %v3949_v53 = vpop.f32.mrb[0].mxu1 }
 0x186   : > { %v1303_v12 = vpop.f32.mrb[1].mxu1 }
 0x187   : > { %v3950_v25 = vpop.f32.mrb[2].mxu1 }
 0x188   : > { %v1306_v22 = vpop.f32.mrb[3].mxu1 }
 0x18d   : > { %v5624_v26 = vpop.f32.mrb[4].mxu1 }
 0x18e   : > { %v5626_v59 = vpop.f32.mrb[5].mxu1 }
 0x18f   : > { %v5628_v5 = vpop.f32.mrb[6].mxu1 }
 0x190   : > { %v5630_v39 = vpop.f32.mrb[7].mxu1 }
 0x195   : > { %v3957_v8 = vpop.f32.mrb[8].mxu1 }
 0x196   : > { %v1335_v44 = vpop.f32.mrb[9].mxu1 }
 0x197   : > { %v3958_v18 = vpop.f32.mrb[10].mxu1 }
 0x198   : > { %v4085_v33 = vpop.f32.mrb[8].mxu0  ;;  %v1338_v52 = vpop.f32.mrb[11].mxu1 }
 0x199   : > { %v4147_v9 = vadd.f32 %v4085_v33, %v3957_v8  ;;  %v2667_v7 = vpop.f32.mrb[9].mxu0 }
 0x19a   : > { %v4149_v16 = vadd.f32 %v2667_v7, %v1335_v44  ;;  %v4086_v2 = vpop.f32.mrb[10].mxu0 }
 0x19b   : > { %v4151_v45 = vadd.f32 %v4086_v2, %v3958_v18  ;;  %v2670_v24 = vpop.f32.mrb[11].mxu0 }
 0x19c   : > { %v4153_v57 = vadd.f32 %v2670_v24, %v1338_v52 }
 0x19d   : > { %v3961_v1 = vpop.f32.mrb[12].mxu1 }
 0x19e   : > { %v1351_v51 = vpop.f32.mrb[13].mxu1 }
 0x19f   : > { %v3962_v60 = vpop.f32.mrb[14].mxu1 }
 0x1a0   : > { %v4089_v36 = vpop.f32.mrb[12].mxu0  ;;  %v1354_v0 = vpop.f32.mrb[15].mxu1 }
 0x1a1   : > { %v4155_v62 = vadd.f32 %v4089_v36, %v3961_v1  ;;  %v2683_v34 = vpop.f32.mrb[13].mxu0 }
 0x1a2   : > { %v4157_v49 = vadd.f32 %v2683_v34, %v1351_v51  ;;  %v4090_v23 = vpop.f32.mrb[14].mxu0 }
 0x1a3   : > { %v4159_v4 = vadd.f32 %v4090_v23, %v3962_v60  ;;  %v2686_v14 = vpop.f32.mrb[15].mxu0 }
 0x1a4   : > { %v4161_v28 = vadd.f32 %v2686_v14, %v1354_v0 }
 0x1a5   : > { %v4117_v13 = vpop.f32.mrb[16].mxu1 }
 0x1a6   : > { %v4148_v48 = vadd.f32 %v4147_v9, %v4117_v13  ;;  %v2941_v56 = vpop.f32.mrb[17].mxu1 }
 0x1a7   : > { %v4150_v61 = vadd.f32 %v4149_v16, %v2941_v56  ;;  %v4118_v3 = vpop.f32.mrb[18].mxu1 }
 0x1a8   : > { %v4109_v55 = vpop.f32.mrb[0].mxu0  ;;  %v3005_v15 = vadd.f32 %v4148_v48, %v5635_v20  ;;  %v4152_v17 = vadd.f32 %v4151_v45, %v4118_v3  ;;  %v2944_v11 = vpop.f32.mrb[19].mxu1 }
 0x1a9   : > { %v4139_v58 = vadd.f32 %v4109_v55, %v3949_v53  ;;  %v2909_v35 = vpop.f32.mrb[1].mxu0  ;;  %v3003_v10 = vadd.f32 %v4150_v61, %v5635_v20  ;;  %v4154_v31 = vadd.f32 %v4153_v57, %v2944_v11 }
 0x1aa   : > { %v4140_v38 = vadd.f32 %v2909_v35, %v1303_v12  ;;  %v4110_v19 = vpop.f32.mrb[2].mxu0  ;;  %v3006_v30 = vadd.f32 %v4152_v17, %v5635_v20  ;;  %v3021_v29 = vmax.f32 %v3005_v15, 0.0 }
 0x1ab   : > { %v2997_v21 = vadd.f32 %v4139_v58, %v5635_v20  ;;  %v4141_v63 = vadd.f32 %v4110_v19, %v3950_v25  ;;  %v2912_v37 = vpop.f32.mrb[3].mxu0  ;;  %v3004_v40 = vadd.f32 %v4154_v31, %v5635_v20  ;;  %v3019_v46 = vmax.f32 %v3003_v10, 0.0 }
 0x1ac   : > { %v2995_v43 = vadd.f32 %v4140_v38, %v5635_v20  ;;  %v3022_v42 = vmax.f32 %v3006_v30, 0.0  ;;  %v4142_v54 = vadd.f32 %v2912_v37, %v1306_v22 }
 0x1ad   : > { %v2998_v50 = vadd.f32 %v4141_v63, %v5635_v20  ;;  %v3020_v47 = vmax.f32 %v3004_v40, 0.0  ;;  %v4121_v41 = vpop.f32.mrb[20].mxu1  ;;  %v3013_v12 = vmax.f32 %v2997_v21, 0.0 }
 0x1ae   : > { %v3672_v32 = vpack.c.bf16 %v3022_v42, %v3021_v29  ;;  %v2996_v27 = vadd.f32 %v4142_v54, %v5635_v20  ;;  %v4156_v6 = vadd.f32 %v4155_v62, %v4121_v41  ;;  %v2957_v53 = vpop.f32.mrb[21].mxu1  ;;  %v3011_v33 = vmax.f32 %v2995_v43, 0.0 }
 0x1af   : > { %v3014_v25 = vmax.f32 %v2998_v50, 0.0  ;;  %v3667_v8 = vpack.c.bf16 %v3020_v47, %v3019_v46  ;;  %v4158_v44 = vadd.f32 %v4157_v49, %v2957_v53  ;;  %v4122_v18 = vpop.f32.mrb[22].mxu1 }
 0x1b0   : > { %3688 = vst [vmem:[%s5648_s21 + $0x28] sm:$0xff] %v3672_v32   ;;  %v3012_v22 = vmax.f32 %v2996_v27, 0.0  ;;  %v4113_v52 = vpop.f32.mrb[4].mxu0  ;;  %v3009_v9 = vadd.f32 %v4156_v6, %v5635_v20  ;;  %v4160_v7 = vadd.f32 %v4159_v4, %v4122_v18  ;;  %v2960_v16 = vpop.f32.mrb[23].mxu1 }
 0x1b1   : > { %v3652_v2 = vpack.c.bf16 %v3014_v25, %v3013_v12  ;;  %3687 = vst [vmem:[%s5648_s21 + $0x20] sm:$0xff] %v3667_v8   ;;  %v4143_v45 = vadd.f32 %v4113_v52, %v5624_v26  ;;  %v2925_v24 = vpop.f32.mrb[5].mxu0  ;;  %v3007_v57 = vadd.f32 %v4158_v44, %v5635_v20  ;;  %v4162_v1 = vadd.f32 %v4161_v28, %v2960_v16 }
 0x1b2   : > { %v3647_v51 = vpack.c.bf16 %v3012_v22, %v3011_v33  ;;  %v4144_v60 = vadd.f32 %v2925_v24, %v5626_v59  ;;  %v4114_v36 = vpop.f32.mrb[6].mxu0  ;;  %v3010_v0 = vadd.f32 %v4160_v7, %v5635_v20  ;;  %v3025_v26 = vmax.f32 %v3009_v9, 0.0 }
 0x1b3   : > { %3684 = vst [vmem:[%s5648_s21 + $0x8] sm:$0xff] %v3652_v2   ;;  %v3001_v62 = vadd.f32 %v4143_v45, %v5635_v20  ;;  %v4145_v34 = vadd.f32 %v4114_v36, %v5628_v5  ;;  %v2928_v49 = vpop.f32.mrb[7].mxu0  ;;  %v3008_v23 = vadd.f32 %v4162_v1, %v5635_v20  ;;  %v3023_v28 = vmax.f32 %v3007_v57, 0.0 }
 0x1b4   : > { %3648 = vst [vmem:[%s5648_s21] sm:$0xff] %v3647_v51   ;;  %v2999_v4 = vadd.f32 %v4144_v60, %v5635_v20  ;;  %v3026_v14 = vmax.f32 %v3010_v0, 0.0  ;;  %v4146_v59 = vadd.f32 %v2928_v49, %v5630_v39 }
 0x1b5   : > { %v3002_v13 = vadd.f32 %v4145_v34, %v5635_v20  ;;  %v3024_v48 = vmax.f32 %v3008_v23, 0.0  ;;  %v3017_v61 = vmax.f32 %v3001_v62, 0.0 }
 0x1b6   : > { %v3682_v56 = vpack.c.bf16 %v3026_v14, %v3025_v26  ;;  %v3000_v5 = vadd.f32 %v4146_v59, %v5635_v20  ;;  %v3015_v15 = vmax.f32 %v2999_v4, 0.0 }
 0x1b7   : > { %v3018_v3 = vmax.f32 %v3002_v13, 0.0  ;;  %v3677_v55 = vpack.c.bf16 %v3024_v48, %v3023_v28 }
 0x1b8   : > { %3690 = vst [vmem:[%s5648_s21 + $0x38] sm:$0xff] %v3682_v56   ;;  %v3016_v17 = vmax.f32 %v3000_v5, 0.0 }
 0x1b9   : > { %v3662_v39 = vpack.c.bf16 %v3018_v3, %v3017_v61  ;;  %3689 = vst [vmem:[%s5648_s21 + $0x30] sm:$0xff] %v3677_v55  }
 0x1ba   : > { %v3657_v20 = vpack.c.bf16 %v3016_v17, %v3015_v15 }
 0x1bb   : > { %3686 = vst [vmem:[%s5648_s21 + $0x18] sm:$0xff] %v3662_v39  }
 0x1bc   : > { %3685 = vst [vmem:[%s5648_s21 + $0x10] sm:$0xff] %v3657_v20  }
 0x1bd   : > { %4472 = shalt.err (!%p4469_p6)
}
 0x1be   : > { %s4473_s20 = scalar_lea.hbm %s5674_s29, 1024  ;;  %s4477_s24 = scalar_lea.hbm %s5737_s3, 4096 }
 0x1bf   : > { %p4474_p7 = scmp.ne.s32.totalorder %s5674_s29, %s4473_s20  ;;  %p4478_p11 = scmp.lt.u32.totalorder %s5674_s29, %s5737_s3 }
 0x1c0   : > { %p4479_p12 = scmp.lt.u32.totalorder %s4477_s24, %s4473_s20  ;;  %p4481_p0 = scmp.lt.u32.totalorder %s4473_s20, %s5674_s29 }
 0x1c1   : > { %p4475_p9 = pnand %p4474_p7, %p4629_p3 }
 0x1c2   : > { %p4480_p13 = por %p4479_p12, %p4478_p11 }
 0x1c3   : > { %p4476_p10 = pneg %p4475_p9 }
 0x1c4   : > { %p4482_p1 = por %p4481_p0, %p4480_p13 }
 0x1c6   : > { %p4483_p2 = pnand %p4482_p1, %p4476_p10 }
 0x1c8   : > { %4486 = shalt.err (!%p4483_p2)
}
 0x1c9   : > { %s4556_s16 = smov 64   ;;  %s4557_s28 = smov 4  }
 0x1ca   : > { %4268 = dma.vmem_to_hbm [thread:$0]  (%p4629_p3), %s5676_s4, 1024, %s5674_s29, %s5682_s6, %s4556_s16, %s4556_s16, %s4557_s28  }
 0x1cb PF: > { %p4274_p4 = scmp.ge.s32.totalorder %s4553_s19, 2  ;;  %s3140_s5 = sand.u32 1, %s4525_s12  }
 0x1cc   : > { %s3141_s7 = scalar_lea.sflag [#allocation3], %s3140_s5 }
 0x1cd   : > { %p4271_p5 = pnand %p4274_p4, %p4638_p8 }
 0x1cf   : > { %4520 = dma.done.wait (!%p4271_p5), %s3141_s7, 1024  }
 0x1d0   : > { %4522 = vsyncadd (!%p4271_p5), %s3141_s7, 4294966272  ;;  %s16_s19 = sadd.s32 1, %s4553_s19   ;;  %s5776_s12 = smov %s4529_s13 }
 0x1d1   : > { %p13_p6 = scmp.ge.s32.totalorder %s16_s19, 6   ;;  %s5777_s13 = smov %s4533_s14 }
 0x1d2   : > { %s5778_s14 = smov %s4647_s30  ;;  %s5779_s15 = smov %s4545_s17 }
 0x1d3   : > { %s5780_s16 = smov %s4549_s18  ;;  %s5781_s17 = smov %s5784_s22 }
 0x1d4   : > { %s5782_s18 = smov %s5788_s23  ;;  %15 = sbr.rel (!%p13_p6) target bundleno = 5 (0x5), region = 84 }
 0x1db   :  { %3146 = vsyncpa [#allocation3], 1 }
 0x1dc   :  { %3148 = vsyncpa [#allocation3 + $0x1], 1 }

</bundles_post_ra>
